<compile_context>
chip_gen: v5e
topology: v5e:2x2
jax: 0.10.0
libtpu: 0.0.40
codegen_flags: <defaults>
</compile_context>

<pallas_src>
import functools

import jax
import jax.numpy as jnp
from jax.experimental import pallas as pl
from jax.experimental.pallas import tpu as pltpu


def _fused_attention_kernel(x_ref, wq_ref, wkv_ref, wp_ref, bp_ref, o_ref, *,
                            num_heads, head_dim, q_tile):
    """One (batch, query-tile) pair per grid step.

    x_ref:   (1, N, C)   f32  (full sequence; invariant along the q-tile axis)
    wq_ref:  (C, C)      bf16 (learned scale pre-folded into the columns)
    wkv_ref: (C, 2C)     bf16
    wp_ref:  (C, C)      bf16
    bp_ref:  (1, C)      f32
    o_ref:   (1, TQ, C)  bf16
    """
    C = num_heads * head_dim
    t = pl.program_id(1)

    # Full-sequence activations (needed for K/V); cast to bf16 once in-kernel
    # so the wrapper does not pay a separate HBM round-trip for the cast.
    x = x_ref[0].astype(jnp.bfloat16)                                  # (N, C)

    # K/V projection over the full sequence; single bf16 cast of the result.
    kv = jnp.dot(x, wkv_ref[...],
                 preferred_element_type=jnp.float32).astype(jnp.bfloat16)   # (N, 2C)

    # Q projection only for this query tile (scale already folded into wq).
    row0 = pl.multiple_of(t * q_tile, q_tile)
    x_t = x_ref[0, pl.ds(row0, q_tile), :].astype(jnp.bfloat16)       # (TQ, C)
    q = jnp.dot(x_t, wq_ref[...],
                preferred_element_type=jnp.float32).astype(jnp.bfloat16)    # (TQ, C)

    wp = wp_ref[...]                                                   # (C, C) bf16

    # Lane-dense f32 accumulator for the already-projected output.
    acc = jnp.zeros((q_tile, C), jnp.float32)

    # Per-head attention, statically unrolled; channel-last throughout.
    for h in range(num_heads):
        lo = h * head_dim
        q_h = q[:, lo:lo + head_dim]                                   # (TQ, hd)
        k_h = kv[:, lo:lo + head_dim]                                  # (N, hd)
        v_h = kv[:, C + lo:C + lo + head_dim]                          # (N, hd)

        # scores = (q * scale) @ k^T   (scale folded into wq)
        s = jax.lax.dot_general(q_h, k_h, (((1,), (1,)), ((), ())),
                                preferred_element_type=jnp.float32)    # (TQ, N)

        # Softmax statistics in f32 (VPU/EUP); exact reciprocal on the EUP.
        m = jnp.max(s, axis=-1, keepdims=True)
        e = jnp.exp(s - m)
        p = e * pl.reciprocal(jnp.sum(e, axis=-1, keepdims=True))      # (TQ, N)

        pv = jnp.dot(p.astype(jnp.bfloat16), v_h,
                     preferred_element_type=jnp.float32)               # (TQ, hd)

        # Fold this head's slice of the output projection here so the running
        # accumulator stays lane-dense (TQ, C): no narrow masked column stores
        # and no (N, C) scratch read-back before the projection.
        acc = acc + jnp.dot(pv.astype(jnp.bfloat16), wp[lo:lo + head_dim, :],
                            preferred_element_type=jnp.float32)

    # Bias once, single bf16 (TQ, C) store.
    o_ref[0] = (acc + bp_ref[...]).astype(o_ref.dtype)


def attention_forward(x, H, W, wq, wkv, wp, bp, scale, num_heads,
                      sr_ratio=1, masked=False, q_tile=None):
    """Forward pass of segformer_shift.Attention (sr_ratio=1, masked=False)."""
    # TODO(synk): sr_ratio > 1 path (strided Conv2d patchify + LayerNorm) not implemented.
    assert sr_ratio == 1, "sr_ratio > 1 path not implemented"
    # TODO(synk): masked=True path (masked_softmax with 1-eye mask) not implemented.
    assert not masked, "masked=True path not implemented"
    # TODO(synk): for very large N the (TQ, N) score buffer still scales with N;
    # switch to flash-style KV tiling (online softmax) to stay inside v7x's 64 MiB VMEM.
    # TODO(synk): when C < 128, repack the output to a 128-multiple last dim
    # (lane-dense stores) once Mosaic reshape of (TQ, C)->(TQ*C/128, 128) is verified.
    # TODO(synk): pack several batch rows per grid step (BB*N M-dim) to feed the
    # 256-wide MXU on v6e/v7x, and use pl.Buffered(1) on the invariant weight specs.

    B, N, C = x.shape
    assert N == H * W and C % num_heads == 0
    head_dim = C // num_heads

    # Query-tile size: bounds the in-kernel score buffer to (TQ, N) and gives
    # pipelining depth / 2-TC work when B is small.
    if q_tile is None:
        q_tile = 128 if (N > 128 and N % 128 == 0) else N
    assert N % q_tile == 0 and (q_tile % 8 == 0 or q_tile == N)
    n_tiles = N // q_tile

    # Fold the learned scalar `scale` into the q projection:
    #   ((x @ wq) @ k^T) * scale == (x @ (wq * scale)) @ k^T
    # Weights are pre-cast to bf16 for the MXU (f32 accumulation in-kernel).
    # In a real model these casts/folds would be precomputed once, not per call.
    wq_bf = (wq * scale[0]).astype(jnp.bfloat16)                       # (C, C)
    wkv_bf = wkv.astype(jnp.bfloat16)                                  # (C, 2C)
    wp_bf = wp.astype(jnp.bfloat16)                                    # (C, C)
    bp_f32 = bp.reshape(1, C).astype(jnp.float32)

    kernel = functools.partial(_fused_attention_kernel, num_heads=num_heads,
                               head_dim=head_dim, q_tile=q_tile)

    # x stays f32 on the way in (cast inside the kernel) to avoid a separate
    # wrapper-side astype HBM round-trip; output is bf16 to halve writeback.
    return pl.pallas_call(
        kernel,
        out_shape=jax.ShapeDtypeStruct((B, N, C), jnp.bfloat16),
        grid=(B, n_tiles),
        in_specs=[
            pl.BlockSpec((1, N, C), lambda b, t: (b, 0, 0)),           # x (full seq, K/V)
            pl.BlockSpec((C, C), lambda b, t: (0, 0)),                 # wq * scale
            pl.BlockSpec((C, 2 * C), lambda b, t: (0, 0)),             # wkv
            pl.BlockSpec((C, C), lambda b, t: (0, 0)),                 # w_proj
            pl.BlockSpec((1, C), lambda b, t: (0, 0)),                 # b_proj
        ],
        out_specs=pl.BlockSpec((1, q_tile, C), lambda b, t: (b, t, 0)),
        compiler_params=pltpu.CompilerParams(
            dimension_semantics=("parallel", "parallel")),
    )(x, wq_bf, wkv_bf, wp_bf, bp_f32)


# --------------------------------------------------------------------------
# Pure-JAX f32 reference (mirrors the PyTorch module) for a correctness check.
# --------------------------------------------------------------------------
def reference_forward(x, wq, wkv, wp, bp, scale, num_heads):
    B, N, C = x.shape
    hd = C // num_heads
    q = (x @ wq).reshape(B, N, num_heads, hd).transpose(0, 2, 1, 3)
    kv = x @ wkv
    k = kv[..., :C].reshape(B, N, num_heads, hd).transpose(0, 2, 1, 3)
    v = kv[..., C:].reshape(B, N, num_heads, hd).transpose(0, 2, 1, 3)
    attn = jnp.einsum("bhqd,bhkd->bhqk", q, k) * scale[0]
    attn = jax.nn.softmax(attn, axis=-1)
    o = jnp.einsum("bhqk,bhkd->bhqd", attn, v).transpose(0, 2, 1, 3).reshape(B, N, C)
    return o @ wp + bp


if __name__ == "__main__":
    # dim=64, num_heads=8 (head_dim=8), H=W=8 -> N=64, batch=2.
    B, C, H, W = 2, 64, 8, 8
    num_heads = 8
    N = H * W
    head_dim = C // num_heads

    key = jax.random.PRNGKey(0)
    k_x, k_q, k_kv, k_p = jax.random.split(key, 4)

    x = jax.random.normal(k_x, (B, N, C), jnp.float32)

    # Deterministic parameter init (trunc_normal std=0.02 ~ normal*0.02, bias=0).
    wq = jax.random.normal(k_q, (C, C), jnp.float32) * 0.02        # q:    (in, out)
    wkv = jax.random.normal(k_kv, (C, 2 * C), jnp.float32) * 0.02  # kv:   (in, 2*out)
    wp = jax.random.normal(k_p, (C, C), jnp.float32) * 0.02        # proj: (in, out)
    bp = jnp.zeros((C,), jnp.float32)                              # proj bias (q/kv have none)
    # scale = ((qk_scale or head_dim) * 0.5) ** (-0.5), a learned scalar parameter.
    scale = jnp.array([(head_dim * 0.5) ** (-0.5)], jnp.float32)

    # q_tile=32 exercises the query-tile grid axis (grid = (2, 2)).
    out = attention_forward(x, H, W, wq, wkv, wp, bp, scale, num_heads, q_tile=32)
    out = jax.block_until_ready(out)

    ref = reference_forward(x, wq, wkv, wp, bp, scale, num_heads)
    assert out.shape == (B, N, C) and out.dtype == jnp.bfloat16
    out_f32 = out.astype(jnp.float32)
    # bf16 MXU operands + bf16 output -> looser tolerance than pure f32.
    max_err = float(jnp.max(jnp.abs(out_f32 - ref)))
    assert jnp.allclose(out_f32, ref, atol=3e-3, rtol=2e-2), \
        f"mismatch vs reference (max abs err {max_err})"

    print("KERNEL_OK")
</pallas_src>

<mosaic_0001>
module attributes {stable_mosaic.version = 11 : i64} {
  func.func @_fused_attention_kernel(%arg0: i32, %arg1: i32, %arg2: memref<1x64x64xf32, #tpu.memory_space<vmem>>, %arg3: memref<64x64xbf16, #tpu.memory_space<vmem>>, %arg4: memref<64x128xbf16, #tpu.memory_space<vmem>>, %arg5: memref<64x64xbf16, #tpu.memory_space<vmem>>, %arg6: memref<1x64xf32, #tpu.memory_space<vmem>>, %arg7: memref<1x32x64xbf16, #tpu.memory_space<vmem>>) attributes {dimension_semantics = [#tpu.dimension_semantics<parallel>, #tpu.dimension_semantics<parallel>], iteration_bounds = array<i64: 2, 2>, scalar_prefetch = 0 : i64, scratch_operands = 0 : i64, tpu.core_type = #tpu.core_type<tc>, window_params = [{transform_indices = @transform_0, window_bounds = array<i64: 1, 64, 64>}, {pipeline_mode = #tpu.pipeline_mode<synchronous>, transform_indices = @transform_1, window_bounds = array<i64: 64, 64>}, {pipeline_mode = #tpu.pipeline_mode<synchronous>, transform_indices = @transform_2, window_bounds = array<i64: 64, 128>}, {pipeline_mode = #tpu.pipeline_mode<synchronous>, transform_indices = @transform_3, window_bounds = array<i64: 64, 64>}, {pipeline_mode = #tpu.pipeline_mode<synchronous>, transform_indices = @transform_4, window_bounds = array<i64: 1, 64>}, {transform_indices = @transform_5, window_bounds = array<i64: 1, 32, 64>}]} {
    %c0 = arith.constant 0 : index
    %c0_0 = arith.constant 0 : index
    %c0_1 = arith.constant 0 : index
    %0 = vector.load %arg2[%c0, %c0_0, %c0_1] : memref<1x64x64xf32, #tpu.memory_space<vmem>>, vector<1x64x64xf32>
    %1 = vector.shape_cast %0 : vector<1x64x64xf32> to vector<64x64xf32>
    %2 = arith.truncf %1 : vector<64x64xf32> to vector<64x64xbf16>
    %c0_2 = arith.constant 0 : index
    %c0_3 = arith.constant 0 : index
    %3 = vector.load %arg4[%c0_2, %c0_3] : memref<64x128xbf16, #tpu.memory_space<vmem>>, vector<64x128xbf16>
    %cst = arith.constant dense<0.000000e+00> : vector<64x128xf32>
    %4 = tpu.matmul %2, %3, %cst {dimension_numbers = #tpu.dot_dimension_numbers<[1], [0], [0], [1], [0, 0, 1, 1], [], []>} : vector<64x64xbf16>, vector<64x128xbf16>, vector<64x128xf32> -> vector<64x128xf32>
    %5 = arith.truncf %4 : vector<64x128xf32> to vector<64x128xbf16>
    %c32_i32 = arith.constant 32 : i32
    %6 = arith.muli %arg1, %c32_i32 : i32
    %7 = tpu.assume_multiple %6, 32 : i32
    %c0_4 = arith.constant 0 : index
    %8 = arith.index_cast %7 : i32 to index
    %c0_5 = arith.constant 0 : index
    %9 = vector.load %arg2[%c0_4, %8, %c0_5] : memref<1x64x64xf32, #tpu.memory_space<vmem>>, vector<1x32x64xf32>
    %10 = vector.shape_cast %9 : vector<1x32x64xf32> to vector<32x64xf32>
    %11 = arith.truncf %10 : vector<32x64xf32> to vector<32x64xbf16>
    %c0_6 = arith.constant 0 : index
    %c0_7 = arith.constant 0 : index
    %12 = vector.load %arg3[%c0_6, %c0_7] : memref<64x64xbf16, #tpu.memory_space<vmem>>, vector<64x64xbf16>
    %cst_8 = arith.constant dense<0.000000e+00> : vector<32x64xf32>
    %13 = tpu.matmul %11, %12, %cst_8 {dimension_numbers = #tpu.dot_dimension_numbers<[1], [0], [0], [1], [0, 0, 1, 1], [], []>} : vector<32x64xbf16>, vector<64x64xbf16>, vector<32x64xf32> -> vector<32x64xf32>
    %14 = arith.truncf %13 : vector<32x64xf32> to vector<32x64xbf16>
    %c0_9 = arith.constant 0 : index
    %c0_10 = arith.constant 0 : index
    %15 = vector.load %arg5[%c0_9, %c0_10] : memref<64x64xbf16, #tpu.memory_space<vmem>>, vector<64x64xbf16>
    %cst_11 = arith.constant 0.000000e+00 : f32
    %16 = vector.broadcast %cst_11 : f32 to vector<32x64xf32>
    %17 = vector.extract_strided_slice %14 {offsets = [0, 0], sizes = [32, 8], strides = [1, 1]} : vector<32x64xbf16> to vector<32x8xbf16>
    %18 = vector.extract_strided_slice %5 {offsets = [0, 0], sizes = [64, 8], strides = [1, 1]} : vector<64x128xbf16> to vector<64x8xbf16>
    %19 = vector.extract_strided_slice %5 {offsets = [0, 64], sizes = [64, 8], strides = [1, 1]} : vector<64x128xbf16> to vector<64x8xbf16>
    %cst_12 = arith.constant dense<0.000000e+00> : vector<32x64xf32>
    %20 = tpu.matmul %17, %18, %cst_12 {dimension_numbers = #tpu.dot_dimension_numbers<[1], [1], [0], [0], [0, 0, 1, 0], [], []>} : vector<32x8xbf16>, vector<64x8xbf16>, vector<32x64xf32> -> vector<32x64xf32>
    %cst_13 = arith.constant dense<0xFF800000> : vector<32xf32>
    %21 = vector.multi_reduction <maximumf>, %20, %cst_13 [1] : vector<32x64xf32> to vector<32xf32>
    %22 = vector.shape_cast %21 : vector<32xf32> to vector<32x1xf32>
    %23 = vector.broadcast %22 : vector<32x1xf32> to vector<32x64xf32>
    %24 = arith.subf %20, %23 : vector<32x64xf32>
    %25 = math.exp %24 : vector<32x64xf32>
    %cst_14 = arith.constant dense<0.000000e+00> : vector<32xf32>
    %26 = vector.multi_reduction <add>, %25, %cst_14 [1] : vector<32x64xf32> to vector<32xf32>
    %27 = vector.shape_cast %26 : vector<32xf32> to vector<32x1xf32>
    %28 = tpu.reciprocal %27 : vector<32x1xf32> -> vector<32x1xf32>
    %29 = vector.broadcast %28 : vector<32x1xf32> to vector<32x64xf32>
    %30 = arith.mulf %25, %29 : vector<32x64xf32>
    %31 = arith.truncf %30 : vector<32x64xf32> to vector<32x64xbf16>
    %cst_15 = arith.constant dense<0.000000e+00> : vector<32x8xf32>
    %32 = tpu.matmul %31, %19, %cst_15 {dimension_numbers = #tpu.dot_dimension_numbers<[1], [0], [0], [1], [0, 0, 1, 1], [], []>} : vector<32x64xbf16>, vector<64x8xbf16>, vector<32x8xf32> -> vector<32x8xf32>
    %33 = arith.truncf %32 : vector<32x8xf32> to vector<32x8xbf16>
    %34 = vector.extract_strided_slice %15 {offsets = [0, 0], sizes = [8, 64], strides = [1, 1]} : vector<64x64xbf16> to vector<8x64xbf16>
    %cst_16 = arith.constant dense<0.000000e+00> : vector<32x64xf32>
    %35 = tpu.matmul %33, %34, %cst_16 {dimension_numbers = #tpu.dot_dimension_numbers<[1], [0], [0], [1], [0, 0, 1, 1], [], []>} : vector<32x8xbf16>, vector<8x64xbf16>, vector<32x64xf32> -> vector<32x64xf32>
    %36 = arith.addf %16, %35 : vector<32x64xf32>
    %37 = vector.extract_strided_slice %14 {offsets = [0, 8], sizes = [32, 8], strides = [1, 1]} : vector<32x64xbf16> to vector<32x8xbf16>
    %38 = vector.extract_strided_slice %5 {offsets = [0, 8], sizes = [64, 8], strides = [1, 1]} : vector<64x128xbf16> to vector<64x8xbf16>
    %39 = vector.extract_strided_slice %5 {offsets = [0, 72], sizes = [64, 8], strides = [1, 1]} : vector<64x128xbf16> to vector<64x8xbf16>
    %cst_17 = arith.constant dense<0.000000e+00> : vector<32x64xf32>
    %40 = tpu.matmul %37, %38, %cst_17 {dimension_numbers = #tpu.dot_dimension_numbers<[1], [1], [0], [0], [0, 0, 1, 0], [], []>} : vector<32x8xbf16>, vector<64x8xbf16>, vector<32x64xf32> -> vector<32x64xf32>
    %cst_18 = arith.constant dense<0xFF800000> : vector<32xf32>
    %41 = vector.multi_reduction <maximumf>, %40, %cst_18 [1] : vector<32x64xf32> to vector<32xf32>
    %42 = vector.shape_cast %41 : vector<32xf32> to vector<32x1xf32>
    %43 = vector.broadcast %42 : vector<32x1xf32> to vector<32x64xf32>
    %44 = arith.subf %40, %43 : vector<32x64xf32>
    %45 = math.exp %44 : vector<32x64xf32>
    %cst_19 = arith.constant dense<0.000000e+00> : vector<32xf32>
    %46 = vector.multi_reduction <add>, %45, %cst_19 [1] : vector<32x64xf32> to vector<32xf32>
    %47 = vector.shape_cast %46 : vector<32xf32> to vector<32x1xf32>
    %48 = tpu.reciprocal %47 : vector<32x1xf32> -> vector<32x1xf32>
    %49 = vector.broadcast %48 : vector<32x1xf32> to vector<32x64xf32>
    %50 = arith.mulf %45, %49 : vector<32x64xf32>
    %51 = arith.truncf %50 : vector<32x64xf32> to vector<32x64xbf16>
    %cst_20 = arith.constant dense<0.000000e+00> : vector<32x8xf32>
    %52 = tpu.matmul %51, %39, %cst_20 {dimension_numbers = #tpu.dot_dimension_numbers<[1], [0], [0], [1], [0, 0, 1, 1], [], []>} : vector<32x64xbf16>, vector<64x8xbf16>, vector<32x8xf32> -> vector<32x8xf32>
    %53 = arith.truncf %52 : vector<32x8xf32> to vector<32x8xbf16>
    %54 = vector.extract_strided_slice %15 {offsets = [8, 0], sizes = [8, 64], strides = [1, 1]} : vector<64x64xbf16> to vector<8x64xbf16>
    %cst_21 = arith.constant dense<0.000000e+00> : vector<32x64xf32>
    %55 = tpu.matmul %53, %54, %cst_21 {dimension_numbers = #tpu.dot_dimension_numbers<[1], [0], [0], [1], [0, 0, 1, 1], [], []>} : vector<32x8xbf16>, vector<8x64xbf16>, vector<32x64xf32> -> vector<32x64xf32>
    %56 = arith.addf %36, %55 : vector<32x64xf32>
    %57 = vector.extract_strided_slice %14 {offsets = [0, 16], sizes = [32, 8], strides = [1, 1]} : vector<32x64xbf16> to vector<32x8xbf16>
    %58 = vector.extract_strided_slice %5 {offsets = [0, 16], sizes = [64, 8], strides = [1, 1]} : vector<64x128xbf16> to vector<64x8xbf16>
    %59 = vector.extract_strided_slice %5 {offsets = [0, 80], sizes = [64, 8], strides = [1, 1]} : vector<64x128xbf16> to vector<64x8xbf16>
    %cst_22 = arith.constant dense<0.000000e+00> : vector<32x64xf32>
    %60 = tpu.matmul %57, %58, %cst_22 {dimension_numbers = #tpu.dot_dimension_numbers<[1], [1], [0], [0], [0, 0, 1, 0], [], []>} : vector<32x8xbf16>, vector<64x8xbf16>, vector<32x64xf32> -> vector<32x64xf32>
    %cst_23 = arith.constant dense<0xFF800000> : vector<32xf32>
    %61 = vector.multi_reduction <maximumf>, %60, %cst_23 [1] : vector<32x64xf32> to vector<32xf32>
    %62 = vector.shape_cast %61 : vector<32xf32> to vector<32x1xf32>
    %63 = vector.broadcast %62 : vector<32x1xf32> to vector<32x64xf32>
    %64 = arith.subf %60, %63 : vector<32x64xf32>
    %65 = math.exp %64 : vector<32x64xf32>
    %cst_24 = arith.constant dense<0.000000e+00> : vector<32xf32>
    %66 = vector.multi_reduction <add>, %65, %cst_24 [1] : vector<32x64xf32> to vector<32xf32>
    %67 = vector.shape_cast %66 : vector<32xf32> to vector<32x1xf32>
    %68 = tpu.reciprocal %67 : vector<32x1xf32> -> vector<32x1xf32>
    %69 = vector.broadcast %68 : vector<32x1xf32> to vector<32x64xf32>
    %70 = arith.mulf %65, %69 : vector<32x64xf32>
    %71 = arith.truncf %70 : vector<32x64xf32> to vector<32x64xbf16>
    %cst_25 = arith.constant dense<0.000000e+00> : vector<32x8xf32>
    %72 = tpu.matmul %71, %59, %cst_25 {dimension_numbers = #tpu.dot_dimension_numbers<[1], [0], [0], [1], [0, 0, 1, 1], [], []>} : vector<32x64xbf16>, vector<64x8xbf16>, vector<32x8xf32> -> vector<32x8xf32>
    %73 = arith.truncf %72 : vector<32x8xf32> to vector<32x8xbf16>
    %74 = vector.extract_strided_slice %15 {offsets = [16, 0], sizes = [8, 64], strides = [1, 1]} : vector<64x64xbf16> to vector<8x64xbf16>
    %cst_26 = arith.constant dense<0.000000e+00> : vector<32x64xf32>
    %75 = tpu.matmul %73, %74, %cst_26 {dimension_numbers = #tpu.dot_dimension_numbers<[1], [0], [0], [1], [0, 0, 1, 1], [], []>} : vector<32x8xbf16>, vector<8x64xbf16>, vector<32x64xf32> -> vector<32x64xf32>
    %76 = arith.addf %56, %75 : vector<32x64xf32>
    %77 = vector.extract_strided_slice %14 {offsets = [0, 24], sizes = [32, 8], strides = [1, 1]} : vector<32x64xbf16> to vector<32x8xbf16>
    %78 = vector.extract_strided_slice %5 {offsets = [0, 24], sizes = [64, 8], strides = [1, 1]} : vector<64x128xbf16> to vector<64x8xbf16>
    %79 = vector.extract_strided_slice %5 {offsets = [0, 88], sizes = [64, 8], strides = [1, 1]} : vector<64x128xbf16> to vector<64x8xbf16>
    %cst_27 = arith.constant dense<0.000000e+00> : vector<32x64xf32>
    %80 = tpu.matmul %77, %78, %cst_27 {dimension_numbers = #tpu.dot_dimension_numbers<[1], [1], [0], [0], [0, 0, 1, 0], [], []>} : vector<32x8xbf16>, vector<64x8xbf16>, vector<32x64xf32> -> vector<32x64xf32>
    %cst_28 = arith.constant dense<0xFF800000> : vector<32xf32>
    %81 = vector.multi_reduction <maximumf>, %80, %cst_28 [1] : vector<32x64xf32> to vector<32xf32>
    %82 = vector.shape_cast %81 : vector<32xf32> to vector<32x1xf32>
    %83 = vector.broadcast %82 : vector<32x1xf32> to vector<32x64xf32>
    %84 = arith.subf %80, %83 : vector<32x64xf32>
    %85 = math.exp %84 : vector<32x64xf32>
    %cst_29 = arith.constant dense<0.000000e+00> : vector<32xf32>
    %86 = vector.multi_reduction <add>, %85, %cst_29 [1] : vector<32x64xf32> to vector<32xf32>
    %87 = vector.shape_cast %86 : vector<32xf32> to vector<32x1xf32>
    %88 = tpu.reciprocal %87 : vector<32x1xf32> -> vector<32x1xf32>
    %89 = vector.broadcast %88 : vector<32x1xf32> to vector<32x64xf32>
    %90 = arith.mulf %85, %89 : vector<32x64xf32>
    %91 = arith.truncf %90 : vector<32x64xf32> to vector<32x64xbf16>
    %cst_30 = arith.constant dense<0.000000e+00> : vector<32x8xf32>
    %92 = tpu.matmul %91, %79, %cst_30 {dimension_numbers = #tpu.dot_dimension_numbers<[1], [0], [0], [1], [0, 0, 1, 1], [], []>} : vector<32x64xbf16>, vector<64x8xbf16>, vector<32x8xf32> -> vector<32x8xf32>
    %93 = arith.truncf %92 : vector<32x8xf32> to vector<32x8xbf16>
    %94 = vector.extract_strided_slice %15 {offsets = [24, 0], sizes = [8, 64], strides = [1, 1]} : vector<64x64xbf16> to vector<8x64xbf16>
    %cst_31 = arith.constant dense<0.000000e+00> : vector<32x64xf32>
    %95 = tpu.matmul %93, %94, %cst_31 {dimension_numbers = #tpu.dot_dimension_numbers<[1], [0], [0], [1], [0, 0, 1, 1], [], []>} : vector<32x8xbf16>, vector<8x64xbf16>, vector<32x64xf32> -> vector<32x64xf32>
    %96 = arith.addf %76, %95 : vector<32x64xf32>
    %97 = vector.extract_strided_slice %14 {offsets = [0, 32], sizes = [32, 8], strides = [1, 1]} : vector<32x64xbf16> to vector<32x8xbf16>
    %98 = vector.extract_strided_slice %5 {offsets = [0, 32], sizes = [64, 8], strides = [1, 1]} : vector<64x128xbf16> to vector<64x8xbf16>
    %99 = vector.extract_strided_slice %5 {offsets = [0, 96], sizes = [64, 8], strides = [1, 1]} : vector<64x128xbf16> to vector<64x8xbf16>
    %cst_32 = arith.constant dense<0.000000e+00> : vector<32x64xf32>
    %100 = tpu.matmul %97, %98, %cst_32 {dimension_numbers = #tpu.dot_dimension_numbers<[1], [1], [0], [0], [0, 0, 1, 0], [], []>} : vector<32x8xbf16>, vector<64x8xbf16>, vector<32x64xf32> -> vector<32x64xf32>
    %cst_33 = arith.constant dense<0xFF800000> : vector<32xf32>
    %101 = vector.multi_reduction <maximumf>, %100, %cst_33 [1] : vector<32x64xf32> to vector<32xf32>
    %102 = vector.shape_cast %101 : vector<32xf32> to vector<32x1xf32>
    %103 = vector.broadcast %102 : vector<32x1xf32> to vector<32x64xf32>
    %104 = arith.subf %100, %103 : vector<32x64xf32>
    %105 = math.exp %104 : vector<32x64xf32>
    %cst_34 = arith.constant dense<0.000000e+00> : vector<32xf32>
    %106 = vector.multi_reduction <add>, %105, %cst_34 [1] : vector<32x64xf32> to vector<32xf32>
    %107 = vector.shape_cast %106 : vector<32xf32> to vector<32x1xf32>
    %108 = tpu.reciprocal %107 : vector<32x1xf32> -> vector<32x1xf32>
    %109 = vector.broadcast %108 : vector<32x1xf32> to vector<32x64xf32>
    %110 = arith.mulf %105, %109 : vector<32x64xf32>
    %111 = arith.truncf %110 : vector<32x64xf32> to vector<32x64xbf16>
    %cst_35 = arith.constant dense<0.000000e+00> : vector<32x8xf32>
    %112 = tpu.matmul %111, %99, %cst_35 {dimension_numbers = #tpu.dot_dimension_numbers<[1], [0], [0], [1], [0, 0, 1, 1], [], []>} : vector<32x64xbf16>, vector<64x8xbf16>, vector<32x8xf32> -> vector<32x8xf32>
    %113 = arith.truncf %112 : vector<32x8xf32> to vector<32x8xbf16>
    %114 = vector.extract_strided_slice %15 {offsets = [32, 0], sizes = [8, 64], strides = [1, 1]} : vector<64x64xbf16> to vector<8x64xbf16>
    %cst_36 = arith.constant dense<0.000000e+00> : vector<32x64xf32>
    %115 = tpu.matmul %113, %114, %cst_36 {dimension_numbers = #tpu.dot_dimension_numbers<[1], [0], [0], [1], [0, 0, 1, 1], [], []>} : vector<32x8xbf16>, vector<8x64xbf16>, vector<32x64xf32> -> vector<32x64xf32>
    %116 = arith.addf %96, %115 : vector<32x64xf32>
    %117 = vector.extract_strided_slice %14 {offsets = [0, 40], sizes = [32, 8], strides = [1, 1]} : vector<32x64xbf16> to vector<32x8xbf16>
    %118 = vector.extract_strided_slice %5 {offsets = [0, 40], sizes = [64, 8], strides = [1, 1]} : vector<64x128xbf16> to vector<64x8xbf16>
    %119 = vector.extract_strided_slice %5 {offsets = [0, 104], sizes = [64, 8], strides = [1, 1]} : vector<64x128xbf16> to vector<64x8xbf16>
    %cst_37 = arith.constant dense<0.000000e+00> : vector<32x64xf32>
    %120 = tpu.matmul %117, %118, %cst_37 {dimension_numbers = #tpu.dot_dimension_numbers<[1], [1], [0], [0], [0, 0, 1, 0], [], []>} : vector<32x8xbf16>, vector<64x8xbf16>, vector<32x64xf32> -> vector<32x64xf32>
    %cst_38 = arith.constant dense<0xFF800000> : vector<32xf32>
    %121 = vector.multi_reduction <maximumf>, %120, %cst_38 [1] : vector<32x64xf32> to vector<32xf32>
    %122 = vector.shape_cast %121 : vector<32xf32> to vector<32x1xf32>
    %123 = vector.broadcast %122 : vector<32x1xf32> to vector<32x64xf32>
    %124 = arith.subf %120, %123 : vector<32x64xf32>
    %125 = math.exp %124 : vector<32x64xf32>
    %cst_39 = arith.constant dense<0.000000e+00> : vector<32xf32>
    %126 = vector.multi_reduction <add>, %125, %cst_39 [1] : vector<32x64xf32> to vector<32xf32>
    %127 = vector.shape_cast %126 : vector<32xf32> to vector<32x1xf32>
    %128 = tpu.reciprocal %127 : vector<32x1xf32> -> vector<32x1xf32>
    %129 = vector.broadcast %128 : vector<32x1xf32> to vector<32x64xf32>
    %130 = arith.mulf %125, %129 : vector<32x64xf32>
    %131 = arith.truncf %130 : vector<32x64xf32> to vector<32x64xbf16>
    %cst_40 = arith.constant dense<0.000000e+00> : vector<32x8xf32>
    %132 = tpu.matmul %131, %119, %cst_40 {dimension_numbers = #tpu.dot_dimension_numbers<[1], [0], [0], [1], [0, 0, 1, 1], [], []>} : vector<32x64xbf16>, vector<64x8xbf16>, vector<32x8xf32> -> vector<32x8xf32>
    %133 = arith.truncf %132 : vector<32x8xf32> to vector<32x8xbf16>
    %134 = vector.extract_strided_slice %15 {offsets = [40, 0], sizes = [8, 64], strides = [1, 1]} : vector<64x64xbf16> to vector<8x64xbf16>
    %cst_41 = arith.constant dense<0.000000e+00> : vector<32x64xf32>
    %135 = tpu.matmul %133, %134, %cst_41 {dimension_numbers = #tpu.dot_dimension_numbers<[1], [0], [0], [1], [0, 0, 1, 1], [], []>} : vector<32x8xbf16>, vector<8x64xbf16>, vector<32x64xf32> -> vector<32x64xf32>
    %136 = arith.addf %116, %135 : vector<32x64xf32>
    %137 = vector.extract_strided_slice %14 {offsets = [0, 48], sizes = [32, 8], strides = [1, 1]} : vector<32x64xbf16> to vector<32x8xbf16>
    %138 = vector.extract_strided_slice %5 {offsets = [0, 48], sizes = [64, 8], strides = [1, 1]} : vector<64x128xbf16> to vector<64x8xbf16>
    %139 = vector.extract_strided_slice %5 {offsets = [0, 112], sizes = [64, 8], strides = [1, 1]} : vector<64x128xbf16> to vector<64x8xbf16>
    %cst_42 = arith.constant dense<0.000000e+00> : vector<32x64xf32>
    %140 = tpu.matmul %137, %138, %cst_42 {dimension_numbers = #tpu.dot_dimension_numbers<[1], [1], [0], [0], [0, 0, 1, 0], [], []>} : vector<32x8xbf16>, vector<64x8xbf16>, vector<32x64xf32> -> vector<32x64xf32>
    %cst_43 = arith.constant dense<0xFF800000> : vector<32xf32>
    %141 = vector.multi_reduction <maximumf>, %140, %cst_43 [1] : vector<32x64xf32> to vector<32xf32>
    %142 = vector.shape_cast %141 : vector<32xf32> to vector<32x1xf32>
    %143 = vector.broadcast %142 : vector<32x1xf32> to vector<32x64xf32>
    %144 = arith.subf %140, %143 : vector<32x64xf32>
    %145 = math.exp %144 : vector<32x64xf32>
    %cst_44 = arith.constant dense<0.000000e+00> : vector<32xf32>
    %146 = vector.multi_reduction <add>, %145, %cst_44 [1] : vector<32x64xf32> to vector<32xf32>
    %147 = vector.shape_cast %146 : vector<32xf32> to vector<32x1xf32>
    %148 = tpu.reciprocal %147 : vector<32x1xf32> -> vector<32x1xf32>
    %149 = vector.broadcast %148 : vector<32x1xf32> to vector<32x64xf32>
    %150 = arith.mulf %145, %149 : vector<32x64xf32>
    %151 = arith.truncf %150 : vector<32x64xf32> to vector<32x64xbf16>
    %cst_45 = arith.constant dense<0.000000e+00> : vector<32x8xf32>
    %152 = tpu.matmul %151, %139, %cst_45 {dimension_numbers = #tpu.dot_dimension_numbers<[1], [0], [0], [1], [0, 0, 1, 1], [], []>} : vector<32x64xbf16>, vector<64x8xbf16>, vector<32x8xf32> -> vector<32x8xf32>
    %153 = arith.truncf %152 : vector<32x8xf32> to vector<32x8xbf16>
    %154 = vector.extract_strided_slice %15 {offsets = [48, 0], sizes = [8, 64], strides = [1, 1]} : vector<64x64xbf16> to vector<8x64xbf16>
    %cst_46 = arith.constant dense<0.000000e+00> : vector<32x64xf32>
    %155 = tpu.matmul %153, %154, %cst_46 {dimension_numbers = #tpu.dot_dimension_numbers<[1], [0], [0], [1], [0, 0, 1, 1], [], []>} : vector<32x8xbf16>, vector<8x64xbf16>, vector<32x64xf32> -> vector<32x64xf32>
    %156 = arith.addf %136, %155 : vector<32x64xf32>
    %157 = vector.extract_strided_slice %14 {offsets = [0, 56], sizes = [32, 8], strides = [1, 1]} : vector<32x64xbf16> to vector<32x8xbf16>
    %158 = vector.extract_strided_slice %5 {offsets = [0, 56], sizes = [64, 8], strides = [1, 1]} : vector<64x128xbf16> to vector<64x8xbf16>
    %159 = vector.extract_strided_slice %5 {offsets = [0, 120], sizes = [64, 8], strides = [1, 1]} : vector<64x128xbf16> to vector<64x8xbf16>
    %cst_47 = arith.constant dense<0.000000e+00> : vector<32x64xf32>
    %160 = tpu.matmul %157, %158, %cst_47 {dimension_numbers = #tpu.dot_dimension_numbers<[1], [1], [0], [0], [0, 0, 1, 0], [], []>} : vector<32x8xbf16>, vector<64x8xbf16>, vector<32x64xf32> -> vector<32x64xf32>
    %cst_48 = arith.constant dense<0xFF800000> : vector<32xf32>
    %161 = vector.multi_reduction <maximumf>, %160, %cst_48 [1] : vector<32x64xf32> to vector<32xf32>
    %162 = vector.shape_cast %161 : vector<32xf32> to vector<32x1xf32>
    %163 = vector.broadcast %162 : vector<32x1xf32> to vector<32x64xf32>
    %164 = arith.subf %160, %163 : vector<32x64xf32>
    %165 = math.exp %164 : vector<32x64xf32>
    %cst_49 = arith.constant dense<0.000000e+00> : vector<32xf32>
    %166 = vector.multi_reduction <add>, %165, %cst_49 [1] : vector<32x64xf32> to vector<32xf32>
    %167 = vector.shape_cast %166 : vector<32xf32> to vector<32x1xf32>
    %168 = tpu.reciprocal %167 : vector<32x1xf32> -> vector<32x1xf32>
    %169 = vector.broadcast %168 : vector<32x1xf32> to vector<32x64xf32>
    %170 = arith.mulf %165, %169 : vector<32x64xf32>
    %171 = arith.truncf %170 : vector<32x64xf32> to vector<32x64xbf16>
    %cst_50 = arith.constant dense<0.000000e+00> : vector<32x8xf32>
    %172 = tpu.matmul %171, %159, %cst_50 {dimension_numbers = #tpu.dot_dimension_numbers<[1], [0], [0], [1], [0, 0, 1, 1], [], []>} : vector<32x64xbf16>, vector<64x8xbf16>, vector<32x8xf32> -> vector<32x8xf32>
    %173 = arith.truncf %172 : vector<32x8xf32> to vector<32x8xbf16>
    %174 = vector.extract_strided_slice %15 {offsets = [56, 0], sizes = [8, 64], strides = [1, 1]} : vector<64x64xbf16> to vector<8x64xbf16>
    %cst_51 = arith.constant dense<0.000000e+00> : vector<32x64xf32>
    %175 = tpu.matmul %173, %174, %cst_51 {dimension_numbers = #tpu.dot_dimension_numbers<[1], [0], [0], [1], [0, 0, 1, 1], [], []>} : vector<32x8xbf16>, vector<8x64xbf16>, vector<32x64xf32> -> vector<32x64xf32>
    %176 = arith.addf %156, %175 : vector<32x64xf32>
    %c0_52 = arith.constant 0 : index
    %c0_53 = arith.constant 0 : index
    %177 = vector.load %arg6[%c0_52, %c0_53] : memref<1x64xf32, #tpu.memory_space<vmem>>, vector<1x64xf32>
    %178 = vector.broadcast %177 : vector<1x64xf32> to vector<32x64xf32>
    %179 = arith.addf %176, %178 : vector<32x64xf32>
    %180 = arith.truncf %179 : vector<32x64xf32> to vector<32x64xbf16>
    %c0_54 = arith.constant 0 : index
    %c0_55 = arith.constant 0 : index
    %c0_56 = arith.constant 0 : index
    %181 = vector.load %arg7[%c0_54, %c0_55, %c0_56] : memref<1x32x64xbf16, #tpu.memory_space<vmem>>, vector<1x32x64xbf16>
    %182 = vector.shape_cast %181 : vector<1x32x64xbf16> to vector<32x64xbf16>
    %183 = vector.shape_cast %180 : vector<32x64xbf16> to vector<1x32x64xbf16>
    tpu.vector_store %arg7[%c0_54, %c0_55, %c0_56], %183 {strides = array<i32>} : memref<1x32x64xbf16, #tpu.memory_space<vmem>>, vector<1x32x64xbf16>,
    return
  }
  func.func @transform_0(%arg0: i32, %arg1: i32) -> (i32, i32, i32) {
    %c0_i32 = arith.constant 0 : i32
    %c0_i32_0 = arith.constant 0 : i32
    %c0_i32_1 = arith.constant 0 : i32
    return %arg0, %c0_i32, %c0_i32_0 : i32, i32, i32
  }
  func.func @transform_1(%arg0: i32, %arg1: i32) -> (i32, i32) {
    %c0_i32 = arith.constant 0 : i32
    %c0_i32_0 = arith.constant 0 : i32
    %c0_i32_1 = arith.constant 0 : i32
    return %c0_i32, %c0_i32_0 : i32, i32
  }
  func.func @transform_2(%arg0: i32, %arg1: i32) -> (i32, i32) {
    %c0_i32 = arith.constant 0 : i32
    %c0_i32_0 = arith.constant 0 : i32
    %c0_i32_1 = arith.constant 0 : i32
    return %c0_i32, %c0_i32_0 : i32, i32
  }
  func.func @transform_3(%arg0: i32, %arg1: i32) -> (i32, i32) {
    %c0_i32 = arith.constant 0 : i32
    %c0_i32_0 = arith.constant 0 : i32
    %c0_i32_1 = arith.constant 0 : i32
    return %c0_i32, %c0_i32_0 : i32, i32
  }
  func.func @transform_4(%arg0: i32, %arg1: i32) -> (i32, i32) {
    %c0_i32 = arith.constant 0 : i32
    %c0_i32_0 = arith.constant 0 : i32
    %c0_i32_1 = arith.constant 0 : i32
    return %c0_i32, %c0_i32_0 : i32, i32
  }
  func.func @transform_5(%arg0: i32, %arg1: i32) -> (i32, i32, i32) {
    %c0_i32 = arith.constant 0 : i32
    %c0_i32_0 = arith.constant 0 : i32
    return %arg0, %arg1, %c0_i32 : i32, i32, i32
  }
}

</mosaic_0001>

<bundles_post_ra>
// kernel: tpu_custom_call.1
= control target key start
LH: loop header
LB: loop body
LE: loop exit
PB: predicated region body
PF: predicated region fallthrough
CT: control target
= control target key end

     0   :  { %s3910_s0 = inlined_call_operand.hbm [shape: f32[2,64,64], index: 0, kind: input, shape index: {}]   ;;  %s3911_s1 = inlined_call_operand.hbm [shape: bf16[64,64], index: 1, kind: input, shape index: {}]   ;;  %s3912_s2 = inlined_call_operand.hbm [shape: bf16[64,128], index: 2, kind: input, shape index: {}]   ;;  %s3913_s3 = inlined_call_operand.hbm [shape: bf16[64,64], index: 3, kind: input, shape index: {}]   ;;  %s3914_s4 = inlined_call_operand.vmem [shape: f32[1,64], index: 4, kind: input, shape index: {}]   ;;  %s3915_s5 = inlined_call_operand.hbm [shape: bf16[2,64,64], index: 5, kind: output, shape index: {}]  }
   0x1   :  { %3924 = sst [smem:[#allocation21_spill]] %s3911_s1 }
   0x2   :  { %3925 = sst [smem:[#allocation22_spill]] %s3912_s2 }
   0x3   :  { %3926 = sst [smem:[#allocation23_spill]] %s3913_s3 }
   0x4   :  { %3927 = sst [smem:[#allocation24_spill]] %s3915_s5 }
   0x5   :  { %10 = vsyncpa [#allocation3], 0 }
   0x6   :  { %12 = vsyncpa [#allocation3 + $0x1], 0 }
   0x7   :  { %13 = vsyncpa [#allocation6], 0 }
   0x8   :  { %14 = vsyncpa [#allocation9], 0 }
   0x9   :  { %15 = vsyncpa [#allocation4], 0 }
   0xa   :  { %17 = vsyncpa [#allocation4 + $0x1], 0  ;;  %s3096_s18 = smov 0   ;;  %s3098_s19 = smov 0  }
   0xb   :  { %s3100_s20 = smov 0   ;;  %s3102_s21 = smov 0  }
   0xc   :  { %s3104_s22 = smov 0   ;;  %s3106_s23 = smov 0  }
   0xd   :  { %s3108_s24 = smov 0   ;;  %s3110_s25 = smov 0  }
   0xe   :  { %s3112_s26 = smov 0   ;;  %s3114_s27 = smov 0  }
   0xf   :  { %s3116_s28 = smov 0  }
  0x10 LB: > { %3928 = sst [smem:[#allocation15_spill]] %s3001_s18  ;;  %s2391_s29 = sadd.s32 4294967295, %s3041_s28   ;;  %s3041_s28 = sphi %s3116_s28, %s23_s28   ;;  %s3037_s27 = sphi %s3114_s27, %s3962_s27   ;;  %s3033_s26 = sphi %s3112_s26, %s3953_s26   ;;  %s3029_s25 = sphi %s3110_s25, %s3961_s25   ;;  %s3025_s24 = sphi %s3108_s24, %s3952_s24   ;;  %s3021_s23 = sphi %s3106_s23, %s3960_s23   ;;  %s3017_s22 = sphi %s3104_s22, %s3959_s22   ;;  %s3013_s21 = sphi %s3102_s21, %s3958_s21   ;;  %s3009_s20 = sphi %s3100_s20, %s3957_s20   ;;  %s3005_s19 = sphi %s3098_s19, %s3956_s19   ;;  %s3001_s18 = sphi %s3096_s18, %s3955_s18  }
  0x11   : > { %3929 = sst [smem:[#allocation16_spill]] %s3033_s26  ;;  %s2392_s30 = sadd.s32 4294967294, %s3041_s28  }
  0x12   : > { %p55_p0 = scmp.ne.s32.totalorder %s3017_s22, %s3013_s21  ;;  %p3152_p1 = scmp.eq.s32.totalorder %s2391_s29, 0 }
  0x13   : > { %p164_p2 = scmp.ne.s32.totalorder %s3009_s20, %s3005_s19  ;;  %p165_p3 = scmp.eq.s32.totalorder %s2391_s29, 3 }
  0x14   : > { %p3160_p4 = por %p3152_p1, %p55_p0  ;;  %p170_p5 = scmp.ne.s32.totalorder %s3005_s19, %s3001_s18 }
  0x15   : > { %p3166_p6 = por %p165_p3, %p164_p2  ;;  %p171_p7 = scmp.eq.s32.totalorder %s2392_s30, 3 }
  0x16   : > { %p2393_p8 = scmp.ge.s32.totalorder %s3041_s28, 1  ;;  %p178_p9 = scmp.lt.s32.totalorder %s3041_s28, 5 }
  0x17   : > { %s3932_s8 = scalar_select %p3166_p6, 1, 0 }
  0x18   : > { %p3172_p10 = por %p171_p7, %p170_p5  ;;  %p3176_p11 = pnand %p2393_p8, %p178_p9 }
  0x19   : > { %3933 = sst [smem:[#allocation17_spill]] %s3932_s8  ;;  %s3043_s14 = smov [#allocation5]  }
  0x1a   : > { %s3934_s9 = scalar_select %p3172_p10, 1, 0 }
  0x1b   : > { %s3937_s1 = sld [smem:[#allocation21_spill]]  ;;  %p2525_p12 = pneg %p3176_p11 }
  0x1c   : > { %3935 = sst [smem:[#allocation18_spill]] %s3934_s9  ;;  %s191_s15 = sshll.u32 %s3043_s14, 4  ;;  %s192_s15 = int_to_ptr.vmem [resolvable:$true] %s191_s15 }
  0x1d   : > { %p3187_p13 = pnand %p2525_p12, %p3152_p1  ;;  %s3939_s2 = sld [smem:[#allocation22_spill]] }
  0x1e   : > { %s3044_s30 = smov 64   ;;  %s3045_s11 = smov 4  }
  0x1f   : > { %s3940_s3 = sld [smem:[#allocation23_spill]]  ;;  %s3046_s17 = smov [#allocation7]  }
  0x20   : > { %s205_s21 = sshll.u32 %s3046_s17, 4  ;;  %s42_s12 = sadd.s32 1, %s3021_s23  ;;  %s206_s21 = int_to_ptr.vmem [resolvable:$true] %s205_s21 }
  0x21   : > { %s189_s13 = sshll.u32 %s3937_s1, 4  ;;  %p49_p2 = scmp.ne.s32.totalorder %s3021_s23, %s3017_s22  ;;  %s190_s13 = int_to_ptr.hbm [resolvable:$true] %s189_s13 }
  0x22   : > { %2528 = dma.hbm_to_vmem [thread:$0]  (!%p3187_p13), %s190_s13, 512, %s192_s15, [#allocation6], %s3044_s30, %s3044_s30, %s3045_s11  }
  0x23   : > { %s203_s29 = sshll.u32 %s3939_s2, 4  ;;  %s3047_s2 = smov [#allocation8]   ;;  %s204_s29 = int_to_ptr.hbm [resolvable:$true] %s203_s29 }
  0x24   : > { %2531 = dma.hbm_to_vmem [thread:$0]  (!%p3187_p13), %s204_s29, 512, %s206_s21, [#allocation6], %s3044_s30, %s3044_s30, %s3045_s11  }
  0x25   : > { %s217_s1 = sshll.u32 %s3940_s3, 4  ;;  %s219_s9 = sshll.u32 %s3047_s2, 4  ;;  %s218_s1 = int_to_ptr.hbm [resolvable:$true] %s217_s1  ;;  %s220_s9 = int_to_ptr.vmem [resolvable:$true] %s219_s9 }
  0x26   : > { %2534 = dma.hbm_to_vmem [thread:$0]  (!%p3187_p13), %s218_s1, 512, %s220_s9, [#allocation9], %s3044_s30, %s3044_s30, %s3045_s11  }
  0x27   : > { %s32_s13 = sadd.s32 1, %s3033_s26  ;;  %s35_s15 = sadd.s32 1, %s3037_s27 }
  0x28   : > { %p33_p0 = scmp.ge.s32.totalorder %s32_s13, 2  ;;  %p50_p3 = scmp.eq.s32.totalorder %s3041_s28, 0 }
  0x29   : > { %s154_s1 = sadd.s32 1, %s3009_s20  ;;  %p2546_p8 = scmp.lt.s32.totalorder %s3041_s28, 4 }
  0x2a   : > { %s3964_s13 = smov (%p33_p0, %s32_s13), 0  ;;  %s3966_s15 = smov (!%p33_p0, %s35_s15), %s3037_s27 }
  0x2b   : > { %3941 = sst [smem:[#allocation19_spill]] %s3964_s13  ;;  %p3212_p5 = por %p50_p3, %p49_p2 }
  0x2c   : > { %s150_s16 = ssub.s32 %s3033_s26, %s3964_s13  ;;  %p37_p7 = scmp.ge.s32.totalorder %s3966_s15, 2 }
  0x2d   : > { %s236_s9 = sand.u32 1, %s3021_s23   ;;  %s2500_s14 = sshll.u32 %s3037_s27, 6 }
  0x2e   : > { %s3968_s15 = smov (%p37_p7, %s3966_s15), 0  ;;  %s2398_s29 = sshll.u32 %s236_s9, 6 }
  0x2f   : > { %3943 = sst [smem:[#allocation20_spill]] %s3968_s15  ;;  %s39_s30 = ssub.s32 %s3037_s27, %s3968_s15 }
  0x30   : > { %p40_p9 = scmp.eq.s32.totalorder %s39_s30, 0  ;;  %s151_s11 = sor.u32 %s150_s16, %s39_s30 }
  0x31   : > { %p152_p12 = scmp.eq.s32.totalorder %s151_s11, 0  ;;  %s245_s26 = scalar_lea.hbm %s3910_s0, %s2500_s14 }
  0x32   : > { %s3227_s17 = scalar_select %p40_p9, %s3021_s23, %s42_s12  }
  0x33   : > { %s3230_s21 = scalar_select %p152_p12, %s3009_s20, %s154_s1  }
  0x34   : > { %s240_s18 = scalar_lea.vmem [#allocation2], %s2398_s29  ;;  %s246_s5 = sshll.u32 %s245_s26, 4  ;;  %s247_s5 = int_to_ptr.hbm [resolvable:$true] %s246_s5 }
  0x35   : > { %s248_s8 = sshll.u32 %s240_s18, 4  ;;  %p2536_p13 = pnand %p2546_p8, %p3212_p5  ;;  %s249_s8 = int_to_ptr.vmem [resolvable:$true] %s248_s8 }
  0x36   : > { %s237_s15 = scalar_lea.sflag [#allocation3], %s236_s9  ;;  %s3048_s16 = smov 128  }
  0x37   : > { %s3049_s30 = smov 8   ;;  %260 = sbr.rel (%p3176_p11) target bundleno = 3041 (0xbe1), region = 40 }
  0x38   : > { %2538 = dma.hbm_to_vmem [thread:$0]  (!%p2536_p13), %s247_s5, 1024, %s249_s8, %s237_s15, %s3048_s16, %s3048_s16, %s3049_s30  }
  0x39   : > { %s262_s12 = sand.u32 (!%p3176_p11), 1, %s3017_s22  }
  0x3a   : > { %s2402_s3 = sshll.u32 (!%p3176_p11), %s262_s12, 6  ;;  %s263_s13 = scalar_lea.sflag (!%p3176_p11), [#allocation3], %s262_s12 }
  0x3b   : > { %s3242_s1 = scalar_lea.vmem (!%p3176_p11), [#allocation2], %s2402_s3 }
  0x3c   : > { %2984 = dma.done.wait (%p3160_p4), %s263_s13, 1024  }
  0x3d   : > { %2986 = vsyncadd (%p3160_p4), %s263_s13, 4294966272 }
  0x3e   : > { %2988 = dma.done.wait (%p3152_p1), [#allocation6], 1024  }
  0x3f   : > { %2990 = vsyncadd (%p3152_p1), [#allocation6], 4294966272 }
  0x40   : > { %2992 = dma.done.wait (%p3152_p1), [#allocation9], 512  }
  0x41   : > { %2994 = vsyncadd (%p3152_p1), [#allocation9], 4294966784  ;;  %v2504_v0 = vld [vmem:[#allocation7 + $0x18] sm:$0xff]  ;;  %v2503_v1 = vld [vmem:[#allocation7 + $0x10] sm:$0xff]  ;;  %vm355_vm0 = vcmask 523264   ;;  %s2427_s5 = sshll.u32 %s3025_s24, 5 }
  0x42   : > { %372 = vmatpush.bf16.msra.mxu0 %v2504_v0  ;;  %v2502_v2 = vld [vmem:[#allocation7 + $0x8] sm:$0xff]  ;;  %v2501_v3 = vld [vmem:[#allocation7] sm:$0xff]  ;;  %v313_v7 = vld [vmem:[%s3242_s1 + $0x10] sm:$0xff]  ;;  %s406_s18 = scalar_lea.vmem %s3242_s1, %s2427_s5 [#allocation2]  ;;  %vm512_vm1 = vcmask 64512   ;;  %s3050_s26 = smov 64   ;;  %vm879_vm2 = vcmask 1043456  }
  0x43   : > { %v311_v4 = vld [vmem:[%s3242_s1] sm:$0xff]  ;;  %v312_v5 = vld [vmem:[%s3242_s1 + $0x8] sm:$0xff]  ;;  %v314_v8 = vld [vmem:[%s3242_s1 + $0x18] sm:$0xff]  ;;  %s3051_s6 = smov 120   ;;  %s3052_s7 = smov 112  }
  0x44   : > { %v319_v6 = vpack.c.bf16 %v312_v5, %v311_v4  ;;  %v320_v9 = vpack.c.bf16 %v314_v8, %v313_v7  ;;  %v2508_v10 = vld [vmem:[#allocation5 + $0x18] sm:$0xff]  ;;  %v2507_v11 = vld [vmem:[#allocation5 + $0x10] sm:$0xff]  ;;  %v2506_v12 = vld [vmem:[#allocation5 + $0x8] sm:$0xff]  ;;  %s3053_s8 = smov 104   ;;  %s3054_s10 = smov 56  }
  0x45   : > { %455 = vmatpush.bf16.msra.mxu1 %v2508_v10  ;;  %v315_v13 = vld [vmem:[%s3242_s1 + $0x20] sm:$0xff]  ;;  %v316_v14 = vld [vmem:[%s3242_s1 + $0x28] sm:$0xff]  ;;  %v317_v20 = vld [vmem:[%s3242_s1 + $0x30] sm:$0xff]  ;;  %s3055_s15 = smov 48   ;;  %s3056_s2 = smov 40  }
  0x46   : > { %373 = vmatpush.bf16.msra.mxu0 %v2503_v1  ;;  %v2505_v15 = vld [vmem:[#allocation5] sm:$0xff]  ;;  %v408_v17 = vld [vmem:[%s406_s18 + $0x8] sm:$0xff]  ;;  %v321_v18 = vpack.c.bf16 %v316_v14, %v315_v13  ;;  %v318_v21 = vld [vmem:[%s3242_s1 + $0x38] sm:$0xff]  ;;  %s3057_s9 = smov 88   ;;  %s3058_s29 = smov 96  }
  0x47   : > { %v407_v16 = vld [vmem:[%s406_s18] sm:$0xff]  ;;  %v409_v22 = vld [vmem:[%s406_s18 + $0x10] sm:$0xff]  ;;  %v410_v23 = vld [vmem:[%s406_s18 + $0x18] sm:$0xff]  ;;  %v322_v24 = vpack.c.bf16 %v318_v21, %v317_v20  ;;  %s3059_s11 = smov 24   ;;  %s3060_s14 = smov 32  }
  0x48   : > { %v411_v19 = vpack.c.bf16 %v408_v17, %v407_v16  ;;  %v412_v25 = vpack.c.bf16 %v410_v23, %v409_v22  ;;  %s3061_s16 = smov 72   ;;  %s3062_s30 = smov 80  }
  0x49   : > { %456 = vmatpush.bf16.msra.mxu1 %v2507_v11  ;;  %s3063_s12 = smov 16   ;;  %s3064_s3 = smov 8  }
  0x4a   : > { %374 = vmatpush.bf16.msra.mxu0 %v2502_v2  ;;  %s306_s13 = sand.u32 1, %s3005_s19  }
  0x4b   : > { %s2406_s18 = sshll.u32 %s306_s13, 4 }
  0x4d   : > { %457 = vmatpush.bf16.msra.mxu1 %v2506_v12 }
  0x4e   : > { %375 = vmatpush.bf16.msra.mxu0 %v2501_v3 }
  0x51   : > { %2423 = vmatmul.msk.bf16.vlgmr.msra.gmra.mxu0 %vm355_vm0, %v319_v6  ;;  %458 = vmatpush.bf16.msra.mxu1 %v2505_v15 }
  0x54   : > { %2444 = vmatmul.msk.bf16.vlgmr.msra.gmra.mxu1 %vm355_vm0, %v411_v19 }
  0x61   : > { %2424 = vmatmul.msk.bf16.gmra.mxu0 %vm355_vm0, %v320_v9 }
  0x64   : > { %2445 = vmatmul.msk.bf16.gmra.mxu1 %vm355_vm0, %v412_v25 }
  0x71   : > { %2425 = vmatmul.msk.bf16.gmra.mxu0 %vm355_vm0, %v321_v18 }
  0x81   : > { %2426 = vmatmul.msk.bf16.gmra.mxu0 %vm355_vm0, %v322_v24 }
  0xce   : > { %v377_v26 = vpop.f32.mrf.mxu0 }
  0xcf   : > { %v397_v53 = vpack.c.bf16 %v377_v26, %v377_v26 }
  0xd1   : > { %v460_v46 = vpop.f32.mrf.mxu1  ;;  %v500_v57 = vunpack.c.l.b16 %v397_v53 }
  0xd2   : > { %v470_v59 = vpack.c.bf16 %v460_v46, %v460_v46 }
  0xd4   : > { %v486_v63 = vunpack.c.l.b16 %v470_v59 }
  0xd6   : > { %v379_v27 = vpop.f32.mrf.mxu0 }
  0xd7   : > { %v398_v51 = vpack.c.bf16 %v379_v27, %v379_v27 }
  0xd9   : > { %v462_v54 = vpop.f32.mrf.mxu1  ;;  %v501_v55 = vunpack.c.l.b16 %v398_v51 }
  0xda   : > { %v471_v60 = vpack.c.bf16 %v462_v54, %v462_v54 }
  0xdb   : > { %v3284_v58 = vpack.c.b16 %v501_v55, %v500_v57 }
  0xdc   : > { %v487_v0 = vunpack.c.l.b16 %v471_v60 }
  0xdd   : > { %v520_v62 = vsel %vm512_vm1, %v3284_v58, 0 }
  0xde   : > { %v382_v28 = vpop.f32.mrf.mxu0  ;;  %v3288_v1 = vpack.c.b16 %v487_v0, %v486_v63 }
  0xdf   : > { %v399_v47 = vpack.c.bf16 %v382_v28, %v382_v28 }
  0xe1   : > { %v502_v50 = vunpack.c.l.b16 %v399_v47  ;;  %v465_v61 = vpop.f32.mrf.mxu1 }
  0xe2   : > { %v472_v3 = vpack.c.bf16 %v465_v61, %v465_v61 }
  0xe4   : > { %v488_v5 = vunpack.c.l.b16 %v472_v3 }
  0xe6   : > { %v384_v29 = vpop.f32.mrf.mxu0 }
  0xe7   : > { %v400_v44 = vpack.c.bf16 %v384_v29, %v384_v29 }
  0xe9   : > { %v503_v48 = vunpack.c.l.b16 %v400_v44  ;;  %v467_v2 = vpop.f32.mrf.mxu1 }
  0xea   : > { %v473_v4 = vpack.c.bf16 %v467_v2, %v467_v2 }
  0xeb   : > { %v3280_v52 = vpack.c.b16 %v503_v48, %v502_v50 }
  0xec   : > { %v489_v6 = vunpack.c.l.b16 %v473_v4 }
  0xed   : > { %v523_v56 = vsel %vm512_vm1, %v3280_v52, 0 }
  0xee   : > { %v387_v30 = vpop.f32.mrf.mxu0  ;;  %v3292_v7 = vpack.c.b16 %v489_v6, %v488_v5 }
  0xef   : > { %v401_v39 = vpack.c.bf16 %v387_v30, %v387_v30 }
  0xf1   : > { %v504_v43 = vunpack.c.l.b16 %v401_v39 }
  0xf6   : > { %v389_v31 = vpop.f32.mrf.mxu0 }
  0xf7   : > { %v402_v36 = vpack.c.bf16 %v389_v31, %v389_v31 }
  0xf9   : > { %v505_v41 = vunpack.c.l.b16 %v402_v36 }
  0xfb   : > { %v3276_v45 = vpack.c.b16 %v505_v41, %v504_v43 }
  0xfd   : > { %v526_v49 = vsel %vm512_vm1, %v3276_v45, 0 }
  0xfe   : > { %v392_v32 = vpop.f32.mrf.mxu0 }
  0xff   : > { %v403_v33 = vpack.c.bf16 %v392_v32, %v392_v32 }
 0x101   : > { %v506_v37 = vunpack.c.l.b16 %v403_v33 }
 0x106   : > { %v394_v34 = vpop.f32.mrf.mxu0 }
 0x107   : > { %v404_v35 = vpack.c.bf16 %v394_v34, %v394_v34 }
 0x109   : > { %v507_v38 = vunpack.c.l.b16 %v404_v35 }
 0x10b   : > { %v3272_v40 = vpack.c.b16 %v507_v38, %v506_v37  ;;  %v474_v38 = vld [vmem:[#allocation8] sm:$0xf] }
 0x10d   : > { %v529_v42 = vsel %vm512_vm1, %v3272_v40, 0 }
 0x10e   : > { %535 = vmatpush.bf16.xpose.msra.mxu2 %v529_v42  ;;  %v909_v42 = vsel %vm879_vm2, %v474_v38, 0 }
 0x10f   : > { %918 = vmatpush.bf16.msrb.mxu0 %v909_v42 }
 0x116   : > { %536 = vmatpush.bf16.xpose.msra.mxu2 %v526_v49 }
 0x11e   : > { %537 = vmatpush.bf16.xpose.msra.mxu2 %v523_v56 }
 0x126   : > { %538 = vmatpush.bf16.xpose.msra.mxu2 %v520_v62 }
 0x12d   : > { %2446 = vmatmul.msk.bf16.vlgmr.msra.gmra.mxu2 %vm512_vm1, %v3288_v1 }
 0x13d   : > { %2447 = vmatmul.msk.bf16.gmra.mxu2 %vm512_vm1, %v3292_v7 }
 0x1b0   : > { %v540_v8 = vpop.f32.mrf.mxu2 }
 0x1b1   : > { %v550_v9 = vsel %vm355_vm0, %v540_v8, -inf }
 0x1b2   : > { %551 = vmax.xlane.f32.xlu0 %v550_v9 }
 0x1b8   : > { %v542_v10 = vpop.f32.mrf.mxu2 }
 0x1b9   : > { %v553_v11 = vsel %vm355_vm0, %v542_v10, -inf }
 0x1ba   : > { %554 = vmax.xlane.f32.xlu0 %v553_v11 }
 0x1c0   : > { %v545_v12 = vpop.f32.mrf.mxu2 }
 0x1c1   : > { %v556_v13 = vsel %vm355_vm0, %v545_v12, -inf }
 0x1c2   : > { %557 = vmax.xlane.f32.xlu1 %v556_v13 }
 0x1c8   : > { %v547_v14 = vpop.f32.mrf.mxu2 }
 0x1c9   : > { %v559_v15 = vsel %vm355_vm0, %v547_v14, -inf }
 0x1ca   : > { %560 = vmax.xlane.f32.xlu1 %v559_v15 }
 0x1ce   : > { %654 = vrot.lane.b32.xlu0 %v3272_v40, %s3050_s26 }
 0x1e3   : > { %652 = vrot.lane.b32.xlu1 %v3276_v45, %s3050_s26 }
 0x1eb   : > { %648 = vrot.lane.b32.xlu1 %v3284_v58, %s3050_s26 }
 0x1f3   : > { %697 = vrot.lane.b32.xlu1 %v3272_v40, %s3051_s6 }
 0x1fb   : > { %695 = vrot.lane.b32.xlu1 %v3276_v45, %s3051_s6 }
 0x203   : > { %693 = vrot.lane.b32.xlu1 %v3280_v52, %s3051_s6 }
 0x20b   : > { %691 = vrot.lane.b32.xlu1 %v3284_v58, %s3051_s6 }
 0x213   : > { %940 = vrot.lane.b32.xlu1 %v3272_v40, %s3052_s7 }
 0x21b   : > { %1158 = vrot.lane.b32.xlu1 %v3272_v40, %s3053_s8 }
 0x223   : > { %689 = vrot.lane.b32.xlu1 %v3292_v7, %s3051_s6 }
 0x225   : > { %v552_v16 = vpop.xlane.xlu0 %551 }
 0x226   : > { %v562_v17 = vsub.f32 %v540_v8, %v552_v16 }
 0x228   : > { %v566_v18 = vmul.f32 1.442695, %v562_v17 }
 0x22a   : > { %2663 = vpow2.f32 %v566_v18 }
 0x22b   : > { %1156 = vrot.lane.b32.xlu1 %v3276_v45, %s3053_s8 }
 0x22d   : > { %v555_v19 = vpop.xlane.xlu0 %554 }
 0x22e   : > { %v563_v20 = vsub.f32 %v542_v10, %v555_v19 }
 0x230   : > { %v3322_v21 = vpop.eup %2663  ;;  %v568_v22 = vmul.f32 1.442695, %v563_v20 }
 0x231   : > { %v574_v23 = vsel %vm355_vm0, %v3322_v21, 0.0 }
 0x232   : > { %2665 = vpow2.f32 %v568_v22  ;;  %575 = vadd.xlane.f32.xlu2 %v574_v23 }
 0x233   : > { %930 = vrot.lane.b32.xlu1 %v3288_v1, %s3052_s7 }
 0x235   : > { %v558_v24 = vpop.xlane.xlu1 %557 }
 0x236   : > { %v564_v25 = vsub.f32 %v545_v12, %v558_v24 }
 0x238   : > { %v3328_v26 = vpop.eup %2665  ;;  %v570_v27 = vmul.f32 1.442695, %v564_v25 }
 0x239   : > { %v577_v28 = vsel %vm355_vm0, %v3328_v26, 0.0 }
 0x23a   : > { %2667 = vpow2.f32 %v570_v27  ;;  %578 = vadd.xlane.f32.xlu2 %v577_v28 }
 0x23b   : > { %932 = vrot.lane.b32.xlu1 %v3292_v7, %s3052_s7 }
 0x23d   : > { %v561_v32 = vpop.xlane.xlu1 %560 }
 0x23e   : > { %v565_v37 = vsub.f32 %v547_v14, %v561_v32 }
 0x240   : > { %v3334_v29 = vpop.eup %2667  ;;  %v655_v30 = vpop.permute.xlu0 %654  ;;  %v572_v39 = vmul.f32 1.442695, %v565_v37 }
 0x241   : > { %670 = vmatpush.bf16.msra.mxu3 %v655_v30  ;;  %v580_v31 = vsel %vm355_vm0, %v3334_v29, 0.0 }
 0x242   : > { %581 = vadd.xlane.f32.xlu0 %v580_v31  ;;  %2669 = vpow2.f32 %v572_v39 }
 0x248   : > { %v3354_v47 = vpop.eup %2669 }
 0x249   : > { %v583_v48 = vsel %vm355_vm0, %v3354_v47, 0.0 }
 0x252   : > { %650 = vrot.lane.b32.xlu2 %v3280_v52, %s3050_s26 }
 0x255   : > { %v653_v33 = vpop.permute.xlu1 %652 }
 0x256   : > { %687 = vrot.lane.b32.xlu0 %v3288_v1, %s3051_s6  ;;  %671 = vmatpush.bf16.msra.mxu3 %v653_v33  ;;  %s308_s6 = scalar_lea.vmem [#allocation10], %s2406_s18 }
 0x25d   : > { %v3342_v34 = vpop.permute.xlu1 %648 }
 0x25e   : > { %936 = vrot.lane.b32.xlu0 %v3280_v52, %s3052_s7 }
 0x265   : > { %v698_v35 = vpop.permute.xlu1 %697 }
 0x266   : > { %1154 = vrot.lane.b32.xlu0 %v3280_v52, %s3053_s8  ;;  %v715_v36 = vsel %vm512_vm1, %v698_v35, 0 }
 0x267   : > { %721 = vmatpush.bf16.xpose.msrb.mxu1 %v715_v36 }
 0x26d   : > { %v696_v41 = vpop.permute.xlu1 %695 }
 0x26e   : > { %1148 = vrot.lane.b32.xlu0 %v3288_v1, %s3053_s8  ;;  %v712_v43 = vsel %vm512_vm1, %v696_v41, 0 }
 0x26f   : > { %722 = vmatpush.bf16.xpose.msrb.mxu1 %v712_v43 }
 0x275   : > { %v694_v44 = vpop.permute.xlu1 %693 }
 0x276   : > { %v709_v46 = vsel %vm512_vm1, %v694_v44, 0 }
 0x277   : > { %723 = vmatpush.bf16.xpose.msrb.mxu1 %v709_v46 }
 0x27b   : > { %584 = vadd.xlane.f32.xlu2 %v583_v48 }
 0x27d   : > { %v692_v49 = vpop.permute.xlu1 %691 }
 0x27e   : > { %v706_v50 = vsel %vm512_vm1, %v692_v49, 0 }
 0x27f   : > { %724 = vmatpush.bf16.xpose.msrb.mxu1 %v706_v50 }
 0x285   : > { %v941_v51 = vpop.permute.xlu1 %940 }
 0x286   : > { %v958_v53 = vsel %vm512_vm1, %v941_v51, 0 }
 0x287   : > { %964 = vmatpush.bf16.xpose.msra.mxu1 %v958_v53 }
 0x28d   : > { %v1159_v54 = vpop.permute.xlu1 %1158 }
 0x28e   : > { %v1176_v55 = vsel %vm512_vm1, %v1159_v54, 0 }
 0x28f   : > { %1182 = vmatpush.bf16.xpose.msra.mxu0 %v1176_v55 }
 0x293   : > { %938 = vrot.lane.b32.xlu2 %v3276_v45, %s3052_s7 }
 0x295   : > { %v690_v56 = vpop.permute.xlu1 %689 }
 0x29b   : > { %934 = vrot.lane.b32.xlu2 %v3284_v58, %s3052_s7  ;;  %s2495_s7 = sshll.u32 %s3025_s24, 2 }
 0x29d   : > { %v1157_v57 = vpop.permute.xlu1 %1156 }
 0x29e   : > { %v1173_v59 = vsel %vm512_vm1, %v1157_v57, 0 }
 0x29f   : > { %1183 = vmatpush.bf16.xpose.msra.mxu0 %v1173_v59 }
 0x2a3   : > { %1152 = vrot.lane.b32.xlu2 %v3284_v58, %s3053_s8 }
 0x2a5   : > { %v576_v60 = vpop.xlane.xlu2 %575 }
 0x2a6   : > { %2671 = vrcp.f32 %v576_v60  ;;  %v597_v8 = vand.u32 2147483648, %v576_v60  ;;  %vm591_vm4 = vweird.f32 %v576_v60  ;;  %v595_v9 = vand.u32 2147483647, %v576_v60 }
 0x2a8   : > { %v598_v15 = vor.u32 1.1754944e-38, %v597_v8  ;;  %vm596_vm7 = vcmp.eq.f32.partialorder %v595_v9, 8.507059e+37 }
 0x2ab   : > { %1150 = vrot.lane.b32.xlu2 %v3292_v7, %s3053_s8  ;;  %s2496_s8 = sshll.u32 %s3029_s25, 3  ;;  %s2270_s25 = sshll.u32 %s308_s6, 4  ;;  %s2271_s25 = int_to_ptr.vmem [resolvable:$true] %s2270_s25 }
 0x2ac   : > { %v2672_v61 = vpop.eup %2671 }
 0x2ad   : > { %v587_v62 = vmul.f32 %v2672_v61, %v576_v60  ;;  %v579_v63 = vpop.xlane.xlu2 %578  ;;  %vm592_vm3 = vweird.f32 %v2672_v61 }
 0x2ae   : > { %2673 = vrcp.f32 %v579_v63  ;;  %vm593_vm5 = vmor %vm591_vm4, %vm592_vm3  ;;  %v611_v11 = vand.u32 2147483648, %v579_v63  ;;  %v609_v13 = vand.u32 2147483647, %v579_v63  ;;  %vm605_vm8 = vweird.f32 %v579_v63 }
 0x2af   : > { %v588_v0 = vsub.f32 1.0, %v587_v62 }
 0x2b0   : > { %v612_v17 = vor.u32 1.1754944e-38, %v611_v11  ;;  %vm610_vm10 = vcmp.eq.f32.partialorder %v609_v13, 8.507059e+37 }
 0x2b1   : > { %v589_v2 = vmul.f32 %v2672_v61, %v588_v0 }
 0x2b3   : > { %v590_v4 = vadd.f32 %v2672_v61, %v589_v2 }
 0x2b4   : > { %v2674_v3 = vpop.eup %2673 }
 0x2b5   : > { %v601_v5 = vmul.f32 %v2674_v3, %v579_v63  ;;  %v651_v6 = vpop.permute.xlu2 %650  ;;  %vm606_vm6 = vweird.f32 %v2674_v3  ;;  %v594_v14 = vsel %vm593_vm5, %v2672_v61, %v590_v4  ;;  %v582_v24 = vpop.xlane.xlu0 %581 }
 0x2b6   : > { %672 = vmatpush.bf16.msra.mxu3 %v651_v6  ;;  %vm607_vm9 = vmor %vm605_vm8, %vm606_vm6  ;;  %v599_v18 = vsel %vm596_vm7, %v598_v15, %v594_v14  ;;  %2675 = vrcp.f32 %v582_v24  ;;  %v625_v39 = vand.u32 2147483648, %v582_v24  ;;  %vm619_vm12 = vweird.f32 %v582_v24 }
 0x2b7   : > { %v602_v10 = vsub.f32 1.0, %v601_v5  ;;  %v642_v22 = vmul.f32 %v3322_v21, %v599_v18  ;;  %v623_v42 = vand.u32 2147483647, %v582_v24 }
 0x2b8   : > { %v626_v50 = vor.u32 1.1754944e-38, %v625_v39 }
 0x2b9   : > { %v603_v12 = vmul.f32 %v2674_v3, %v602_v10  ;;  %vm624_vm15 = vcmp.eq.f32.partialorder %v623_v42, 8.507059e+37 }
 0x2ba   : > { %673 = vmatpush.bf16.msra.mxu3 %v3342_v34 }
 0x2bb   : > { %v604_v16 = vadd.f32 %v2674_v3, %v603_v12 }
 0x2bc   : > { %v2676_v32 = vpop.eup %2675 }
 0x2bd   : > { %v608_v19 = vsel %vm607_vm9, %v2674_v3, %v604_v16  ;;  %v615_v33 = vmul.f32 %v2676_v32, %v582_v24  ;;  %vm620_vm11 = vweird.f32 %v2676_v32  ;;  %v931_v3 = vpop.permute.xlu1 %930 }
 0x2be   : > { %v613_v20 = vsel %vm610_vm10, %v612_v17, %v608_v19  ;;  %vm621_vm13 = vmor %vm619_vm12, %vm620_vm11 }
 0x2bf   : > { %v643_v23 = vmul.f32 %v3328_v26, %v613_v20  ;;  %v616_v21 = vsub.f32 1.0, %v615_v33 }
 0x2c1   : > { %v646_v25 = vpack.c.bf16 %v643_v23, %v642_v22  ;;  %v617_v26 = vmul.f32 %v2676_v32, %v616_v21 }
 0x2c3   : > { %2448 = vmatmul.msk.bf16.vlgmr.msra.gmra.mxu3 %vm355_vm0, %v646_v25  ;;  %v618_v36 = vadd.f32 %v2676_v32, %v617_v26 }
 0x2c5   : > { %v622_v49 = vsel %vm621_vm13, %v2676_v32, %v618_v36  ;;  %v933_v4 = vpop.permute.xlu1 %932 }
 0x2c6   : > { %v627_v54 = vsel %vm624_vm15, %v626_v50, %v622_v49 }
 0x2c7   : > { %v644_v60 = vmul.f32 %v3334_v29, %v627_v54 }
 0x2c8   : > { %v688_v27 = vpop.permute.xlu0 %687 }
 0x2c9   : > { %2450 = vmatmul.msk.bf16.vlgmr.msrb.gmra.mxu1 %vm512_vm1, %v688_v27 }
 0x2d0   : > { %v937_v28 = vpop.permute.xlu0 %936 }
 0x2d1   : > { %v952_v57 = vsel %vm512_vm1, %v937_v28, 0 }
 0x2d8   : > { %v1155_v30 = vpop.permute.xlu0 %1154 }
 0x2d9   : > { %v1170_v31 = vsel %vm512_vm1, %v1155_v30, 0  ;;  %2451 = vmatmul.msk.bf16.gmra.mxu1 %vm512_vm1, %v690_v56 }
 0x2da   : > { %1184 = vmatpush.bf16.xpose.msra.mxu0 %v1170_v31 }
 0x2e0   : > { %v1149_v24 = vpop.permute.xlu0 %1148 }
 0x2ee   : > { %v585_v34 = vpop.xlane.xlu2 %584 }
 0x2ef   : > { %2677 = vrcp.f32 %v585_v34  ;;  %v639_v44 = vand.u32 2147483648, %v585_v34  ;;  %v637_v48 = vand.u32 2147483647, %v585_v34  ;;  %vm633_vm3 = vweird.f32 %v585_v34 }
 0x2f1   : > { %v640_v53 = vor.u32 1.1754944e-38, %v639_v44  ;;  %vm638_vm5 = vcmp.eq.f32.partialorder %v637_v48, 8.507059e+37 }
 0x2f5   : > { %v2678_v35 = vpop.eup %2677 }
 0x2f6   : > { %v629_v37 = vmul.f32 %v2678_v35, %v585_v34  ;;  %v939_v38 = vpop.permute.xlu2 %938  ;;  %vm634_vm14 = vweird.f32 %v2678_v35 }
 0x2f7   : > { %v955_v41 = vsel %vm512_vm1, %v939_v38, 0  ;;  %vm635_vm4 = vmor %vm633_vm3, %vm634_vm14 }
 0x2f8   : > { %v630_v43 = vsub.f32 1.0, %v629_v37  ;;  %965 = vmatpush.bf16.xpose.msra.mxu1 %v955_v41 }
 0x2fa   : > { %v631_v46 = vmul.f32 %v2678_v35, %v630_v43 }
 0x2fc   : > { %v632_v51 = vadd.f32 %v2678_v35, %v631_v46 }
 0x2fe   : > { %v935_v55 = vpop.permute.xlu2 %934  ;;  %v636_v56 = vsel %vm635_vm4, %v2678_v35, %v632_v51 }
 0x2ff   : > { %v641_v59 = vsel %vm638_vm5, %v640_v53, %v636_v56  ;;  %v949_v0 = vsel %vm512_vm1, %v935_v55, 0 }
 0x300   : > { %966 = vmatpush.bf16.xpose.msra.mxu1 %v952_v57  ;;  %v645_v61 = vmul.f32 %v3354_v47, %v641_v59 }
 0x302   : > { %v647_v62 = vpack.c.bf16 %v645_v61, %v644_v60 }
 0x304   : > { %2449 = vmatmul.msk.bf16.gmra.mxu3 %vm355_vm0, %v647_v62 }
 0x306   : > { %v1153_v63 = vpop.permute.xlu2 %1152 }
 0x307   : > { %v1167_v2 = vsel %vm512_vm1, %v1153_v63, 0 }
 0x308   : > { %967 = vmatpush.bf16.xpose.msra.mxu1 %v949_v0  ;;  %1185 = vmatpush.bf16.xpose.msra.mxu0 %v1167_v2 }
 0x30e   : > { %v1151_v28 = vpop.permute.xlu2 %1150 }
 0x30f   : > { %2458 = vmatmul.msk.bf16.vlgmr.msra.gmra.mxu1 %vm512_vm1, %v931_v3 }
 0x31f   : > { %2459 = vmatmul.msk.bf16.gmra.mxu1 %vm512_vm1, %v933_v4 }
 0x346   : > { %v675_v5 = vpop.f32.mrf.mxu3  ;;  %v726_v29 = vpop.f32.mrf.mxu1 }
 0x347   : > { %v736_v47 = vsel %vm355_vm0, %v726_v29, -inf }
 0x348   : > { %737 = vmax.xlane.f32.xlu0 %v736_v47 }
 0x34e   : > { %v677_v6 = vpop.f32.mrf.mxu3  ;;  %v728_v8 = vpop.f32.mrf.mxu1 }
 0x34f   : > { %v685_v9 = vpack.c.bf16 %v677_v6, %v675_v5  ;;  %v739_v10 = vsel %vm355_vm0, %v728_v8, -inf }
 0x350   : > { %740 = vmax.xlane.f32.xlu1 %v739_v10 }
 0x351   : > { %2456 = vmatmul.msk.bf16.vlgmr.msrb.gmra.mxu0 %vm512_vm1, %v685_v9 }
 0x356   : > { %v731_v11 = vpop.f32.mrf.mxu1 }
 0x357   : > { %v742_v12 = vsel %vm355_vm0, %v731_v11, -inf }
 0x358   : > { %743 = vmax.xlane.f32.xlu2 %v742_v12 }
 0x35e   : > { %v733_v13 = vpop.f32.mrf.mxu1 }
 0x35f   : > { %v745_v14 = vsel %vm355_vm0, %v733_v13, -inf }
 0x360   : > { %746 = vmax.xlane.f32.xlu0 %v745_v14 }
 0x374   : > { %838 = vrot.lane.b32.xlu0 %v3276_v45, %s3054_s10 }
 0x387   : > { %v680_v15 = vpop.f32.mrf.mxu3 }
 0x38c   : > { %v969_v16 = vpop.f32.mrf.mxu1 }
 0x38d   : > { %v979_v17 = vsel %vm355_vm0, %v969_v16, -inf }
 0x38e   : > { %980 = vmax.xlane.f32.xlu2 %v979_v17 }
 0x38f   : > { %v682_v18 = vpop.f32.mrf.mxu3 }
 0x390   : > { %v686_v19 = vpack.c.bf16 %v682_v18, %v680_v15 }
 0x392   : > { %2457 = vmatmul.msk.bf16.gmra.mxu0 %vm512_vm1, %v686_v19 }
 0x394   : > { %v971_v20 = vpop.f32.mrf.mxu1 }
 0x395   : > { %v982_v22 = vsel %vm355_vm0, %v971_v20, -inf }
 0x396   : > { %983 = vmax.xlane.f32.xlu1 %v982_v22 }
 0x39c   : > { %v3395_v23 = vpop.f32.mrf.mxu1 }
 0x39d   : > { %v985_v44 = vsel %vm355_vm0, %v3395_v23, -inf }
 0x3a2   : > { %2464 = vmatmul.msk.bf16.vlgmr.msra.gmra.mxu0 %vm512_vm1, %v1149_v24 }
 0x3a4   : > { %v3398_v25 = vpop.f32.mrf.mxu1 }
 0x3a5   : > { %v988_v27 = vsel %vm355_vm0, %v3398_v25, -inf }
 0x3a6   : > { %836 = vrot.lane.b32.xlu2 %v3280_v52, %s3054_s10  ;;  %989 = vmax.xlane.f32.xlu0 %v988_v27 }
 0x3ae   : > { %834 = vrot.lane.b32.xlu2 %v3284_v58, %s3054_s10 }
 0x3af   : > { %840 = vrot.lane.b32.xlu1 %v3272_v40, %s3054_s10  ;;  %s2267_s10 = sadd.s32 %s2496_s8, %s2495_s7 }
 0x3b2   : > { %2465 = vmatmul.msk.bf16.gmra.mxu0 %vm512_vm1, %v1151_v28 }
 0x3b7   : > { %1083 = vrot.lane.b32.xlu1 %v3272_v40, %s3055_s15 }
 0x3bb   : > { %v738_v30 = vpop.xlane.xlu0 %737 }
 0x3bc   : > { %v748_v31 = vsub.f32 %v726_v29, %v738_v30 }
 0x3be   : > { %v752_v32 = vmul.f32 1.442695, %v748_v31 }
 0x3c0   : > { %2679 = vpow2.f32 %v752_v32 }
 0x3c3   : > { %v741_v35 = vpop.xlane.xlu1 %740 }
 0x3c4   : > { %v749_v38 = vsub.f32 %v728_v8, %v741_v35 }
 0x3c6   : > { %v3408_v26 = vpop.eup %2679  ;;  %v754_v41 = vmul.f32 1.442695, %v749_v38 }
 0x3c7   : > { %v760_v37 = vsel %vm355_vm0, %v3408_v26, 0.0 }
 0x3cb   : > { %v744_v33 = vpop.xlane.xlu2 %743 }
 0x3cc   : > { %v750_v21 = vsub.f32 %v731_v11, %v744_v33 }
 0x3ce   : > { %v756_v34 = vmul.f32 1.442695, %v750_v21  ;;  %v3426_v53 = vpop.f32.mrf.mxu0 }
 0x3d0   : > { %2681 = vpow2.f32 %v756_v34 }
 0x3d1   : > { %2683 = vpow2.f32 %v754_v41 }
 0x3d3   : > { %v747_v42 = vpop.xlane.xlu0 %746 }
 0x3d4   : > { %v751_v43 = vsub.f32 %v733_v13, %v747_v42 }
 0x3d6   : > { %v3410_v36 = vpop.eup %2681  ;;  %v758_v46 = vmul.f32 1.442695, %v751_v43  ;;  %v3428_v57 = vpop.f32.mrf.mxu0 }
 0x3d7   : > { %761 = vadd.xlane.f32.xlu2 %v760_v37  ;;  %v766_v39 = vsel %vm355_vm0, %v3410_v36, 0.0  ;;  %v3418_v48 = vpop.eup %2683 }
 0x3d8   : > { %767 = vadd.xlane.f32.xlu0 %v766_v39  ;;  %2685 = vpow2.f32 %v758_v46  ;;  %v763_v49 = vsel %vm355_vm0, %v3418_v48, 0.0 }
 0x3de   : > { %v3422_v50 = vpop.eup %2685 }
 0x3df   : > { %v769_v51 = vsel %vm355_vm0, %v3422_v50, 0.0 }
 0x3e1   : > { %986 = vmax.xlane.f32.xlu1 %v985_v44 }
 0x3e6   : > { %v839_v8 = vpop.permute.xlu0 %838 }
 0x3e9   : > { %764 = vadd.xlane.f32.xlu1 %v763_v49 }
 0x3f1   : > { %770 = vadd.xlane.f32.xlu1 %v769_v51 }
 0x401   : > { %v981_v54 = vpop.xlane.xlu2 %980 }
 0x402   : > { %v991_v55 = vsub.f32 %v969_v16, %v981_v54 }
 0x404   : > { %v995_v56 = vmul.f32 1.442695, %v991_v55 }
 0x406   : > { %2687 = vpow2.f32 %v995_v56 }
 0x409   : > { %v984_v59 = vpop.xlane.xlu1 %983  ;;  %v837_v6 = vpop.permute.xlu2 %836 }
 0x40a   : > { %v992_v60 = vsub.f32 %v971_v20, %v984_v59  ;;  %1301 = vrot.lane.b32.xlu1 %v3272_v40, %s3056_s2 }
 0x40c   : > { %v3432_v61 = vpop.eup %2687  ;;  %v997_v62 = vmul.f32 1.442695, %v992_v60 }
 0x40d   : > { %v1003_v63 = vsel %vm355_vm0, %v3432_v61, 0.0 }
 0x40e   : > { %2689 = vpow2.f32 %v997_v62  ;;  %1004 = vadd.xlane.f32.xlu2 %v1003_v63 }
 0x40f   : > { %v3436_v0 = vpop.f32.mrf.mxu0 }
 0x411   : > { %v835_v11 = vpop.permute.xlu2 %834 }
 0x414   : > { %v3438_v2 = vpop.eup %2689 }
 0x415   : > { %v1006_v3 = vsel %vm355_vm0, %v3438_v2, 0.0 }
 0x416   : > { %1007 = vadd.xlane.f32.xlu0 %v1006_v3 }
 0x417   : > { %v3442_v4 = vpop.f32.mrf.mxu0 }
 0x419   : > { %v990_v18 = vpop.xlane.xlu0 %989 }
 0x41a   : > { %v994_v43 = vsub.f32 %v3398_v25, %v990_v18 }
 0x41c   : > { %v1001_v25 = vmul.f32 1.442695, %v994_v43 }
 0x41f   : > { %v3444_v5 = vpop.f32.mrf.mxu0 }
 0x420   : > { %v1197_v29 = vsel %vm355_vm0, %v3444_v5, -inf }
 0x421   : > { %1198 = vmax.xlane.f32.xlu0 %v1197_v29  ;;  %v841_v47 = vpop.permute.xlu1 %840 }
 0x422   : > { %856 = vmatpush.bf16.msrb.mxu3 %v841_v47 }
 0x426   : > { %857 = vmatpush.bf16.msrb.mxu3 %v839_v8 }
 0x427   : > { %v3448_v9 = vpop.f32.mrf.mxu0 }
 0x428   : > { %v1200_v10 = vsel %vm355_vm0, %v3448_v9, -inf }
 0x429   : > { %1201 = vmax.xlane.f32.xlu2 %v1200_v10  ;;  %v1084_v12 = vpop.permute.xlu1 %1083 }
 0x42a   : > { %858 = vmatpush.bf16.msrb.mxu3 %v837_v6 }
 0x42e   : > { %859 = vmatpush.bf16.msrb.mxu3 %v835_v11 }
 0x42f   : > { %v3452_v13 = vpop.f32.mrf.mxu0 }
 0x430   : > { %v1203_v14 = vsel %vm355_vm0, %v3452_v13, -inf }
 0x431   : > { %1204 = vmax.xlane.f32.xlu0 %v1203_v14 }
 0x432   : > { %1099 = vmatpush.bf16.msra.mxu3 %v1084_v12 }
 0x437   : > { %v3456_v15 = vpop.f32.mrf.mxu0 }
 0x438   : > { %v1206_v16 = vsel %vm355_vm0, %v3456_v15, -inf }
 0x439   : > { %1207 = vmax.xlane.f32.xlu2 %v1206_v16 }
 0x445   : > { %1079 = vrot.lane.b32.xlu0 %v3280_v52, %s3055_s15 }
 0x44a   : > { %v762_v17 = vpop.xlane.xlu2 %761 }
 0x44b   : > { %2691 = vrcp.f32 %v762_v17  ;;  %v3469_v28 = vpop.xlane.xlu0 %767  ;;  %v783_v39 = vand.u32 2147483648, %v762_v17  ;;  %vm777_vm7 = vweird.f32 %v762_v17  ;;  %v781_v41 = vand.u32 2147483647, %v762_v17 }
 0x44c   : > { %vm805_vm5 = vweird.f32 %v3469_v28 }
 0x44d   : > { %1077 = vrot.lane.b32.xlu0 %v3284_v58, %s3055_s15  ;;  %v784_v56 = vor.u32 1.1754944e-38, %v783_v39  ;;  %vm782_vm10 = vcmp.eq.f32.partialorder %v781_v41, 8.507059e+37 }
 0x451   : > { %1081 = vrot.lane.b32.xlu2 %v3276_v45, %s3055_s15  ;;  %v2692_v20 = vpop.eup %2691  ;;  %s2497_s15 = sshll.u32 %s2267_s10, 2 }
 0x452   : > { %v773_v27 = vmul.f32 %v2692_v20, %v762_v17  ;;  %vm778_vm6 = vweird.f32 %v2692_v20 }
 0x453   : > { %vm3479_vm8 = vmor %vm777_vm7, %vm778_vm6 }
 0x454   : > { %v987_v19 = vpop.xlane.xlu1 %986  ;;  %v774_v30 = vsub.f32 1.0, %v773_v27 }
 0x455   : > { %v993_v22 = vsub.f32 %v3395_v23, %v987_v19  ;;  %1299 = vrot.lane.b32.xlu0 %v3276_v45, %s3056_s2 }
 0x456   : > { %v775_v33 = vmul.f32 %v2692_v20, %v774_v30 }
 0x457   : > { %v999_v24 = vmul.f32 1.442695, %v993_v22  ;;  %v809_v22 = vand.u32 2147483647, %v3469_v28 }
 0x458   : > { %v776_v35 = vadd.f32 %v2692_v20, %v775_v33 }
 0x459   : > { %2693 = vpow2.f32 %v999_v24 }
 0x45a   : > { %v780_v51 = vsel %vm3479_vm8, %v2692_v20, %v776_v35  ;;  %vm810_vm8 = vcmp.eq.f32.partialorder %v809_v22, 8.507059e+37 }
 0x45b   : > { %v785_v63 = vsel %vm782_vm10, %v784_v56, %v780_v51 }
 0x45c   : > { %v765_v31 = vpop.xlane.xlu1 %764  ;;  %v828_v10 = vmul.f32 %v3408_v26, %v785_v63  ;;  %v811_v26 = vand.u32 2147483648, %v3469_v28 }
 0x45d   : > { %2695 = vrcp.f32 %v765_v31  ;;  %v797_v49 = vand.u32 2147483648, %v765_v31  ;;  %v795_v55 = vand.u32 2147483647, %v765_v31  ;;  %vm791_vm11 = vweird.f32 %v765_v31 }
 0x45e   : > { %2697 = vrcp.f32 %v3469_v28 }
 0x45f   : > { %v3472_v32 = vpop.eup %2693  ;;  %v798_v62 = vor.u32 1.1754944e-38, %v797_v49  ;;  %vm796_vm13 = vcmp.eq.f32.partialorder %v795_v55, 8.507059e+37 }
 0x460   : > { %v1009_v21 = vsel %vm355_vm0, %v3472_v32, 0.0 }
 0x461   : > { %1010 = vadd.xlane.f32.xlu1 %v1009_v21 }
 0x463   : > { %v2696_v23 = vpop.eup %2695 }
 0x464   : > { %v3476_v34 = vpop.eup %2697  ;;  %v787_v37 = vmul.f32 %v2696_v23, %v765_v31  ;;  %v771_v38 = vpop.xlane.xlu1 %770  ;;  %vm792_vm9 = vweird.f32 %v2696_v23  ;;  %v812_v31 = vor.u32 1.1754944e-38, %v811_v26 }
 0x465   : > { %2699 = vrcp.f32 %v771_v38  ;;  %v801_v46 = vmul.f32 %v3476_v34, %v3469_v28  ;;  %vm793_vm12 = vmor %vm791_vm11, %vm792_vm9  ;;  %v825_v18 = vand.u32 2147483648, %v771_v38  ;;  %vm806_vm15 = vweird.f32 %v3476_v34 }
 0x466   : > { %v788_v42 = vsub.f32 1.0, %v787_v37  ;;  %2701 = vpow2.f32 %v1001_v25  ;;  %vm819_vm3 = vweird.f32 %v771_v38  ;;  %v823_v20 = vand.u32 2147483647, %v771_v38  ;;  %vm807_vm6 = vmor %vm805_vm5, %vm806_vm15 }
 0x467   : > { %v802_v3 = vsub.f32 1.0, %v801_v46  ;;  %v826_v27 = vor.u32 1.1754944e-38, %v825_v18 }
 0x468   : > { %v789_v54 = vmul.f32 %v2696_v23, %v788_v42  ;;  %vm824_vm7 = vcmp.eq.f32.partialorder %v823_v20, 8.507059e+37 }
 0x469   : > { %v803_v12 = vmul.f32 %v3476_v34, %v802_v3 }
 0x46a   : > { %v790_v59 = vadd.f32 %v2696_v23, %v789_v54 }
 0x46b   : > { %v2700_v60 = vpop.eup %2699  ;;  %v804_v19 = vadd.f32 %v3476_v34, %v803_v12 }
 0x46c   : > { %v794_v29 = vsel %vm793_vm12, %v2696_v23, %v790_v59  ;;  %v815_v47 = vmul.f32 %v2700_v60, %v771_v38  ;;  %vm820_vm14 = vweird.f32 %v2700_v60 }
 0x46d   : > { %v799_v6 = vsel %vm796_vm13, %v798_v62, %v794_v29  ;;  %vm821_vm4 = vmor %vm819_vm3, %vm820_vm14  ;;  %v808_v30 = vsel %vm807_vm6, %v3476_v34, %v804_v19 }
 0x46e   : > { %v816_v8 = vsub.f32 1.0, %v815_v47  ;;  %v829_v11 = vmul.f32 %v3418_v48, %v799_v6  ;;  %v3494_v48 = vpop.eup %2701  ;;  %v813_v23 = vsel %vm810_vm8, %v812_v31, %v808_v30 }
 0x46f   : > { %v1012_v33 = vsel %vm355_vm0, %v3494_v48, 0.0  ;;  %v830_v28 = vmul.f32 %v3410_v36, %v813_v23 }
 0x470   : > { %v817_v14 = vmul.f32 %v2700_v60, %v816_v8  ;;  %v832_v16 = vpack.c.bf16 %v829_v11, %v828_v10 }
 0x472   : > { %v818_v17 = vadd.f32 %v2700_v60, %v817_v14  ;;  %2452 = vmatmul.msk.bf16.vlgmr.msrb.gmra.mxu3 %vm355_vm0, %v832_v16 }
 0x474   : > { %v822_v24 = vsel %vm821_vm4, %v2700_v60, %v818_v17 }
 0x475   : > { %v827_v21 = vsel %vm824_vm7, %v826_v27, %v822_v24 }
 0x476   : > { %v831_v37 = vmul.f32 %v3422_v50, %v827_v21 }
 0x478   : > { %v833_v38 = vpack.c.bf16 %v831_v37, %v830_v28 }
 0x47a   : > { %1013 = vadd.xlane.f32.xlu2 %v1012_v33 }
 0x47c   : > { %v1302_v35 = vpop.permute.xlu1 %1301 }
 0x47d   : > { %1317 = vmatpush.bf16.msrb.mxu1 %v1302_v35 }
 0x481   : > { %v1005_v34 = vpop.xlane.xlu2 %1004 }
 0x482   : > { %2453 = vmatmul.msk.bf16.gmra.mxu3 %vm355_vm0, %v833_v38  ;;  %v1026_v14 = vand.u32 2147483648, %v1005_v34  ;;  %vm1020_vm13 = vweird.f32 %v1005_v34  ;;  %v1024_v16 = vand.u32 2147483647, %v1005_v34  ;;  %v477_v38 = vld [vmem:[#allocation8 + $0xc] sm:$0xf] }
 0x484   : > { %v1027_v22 = vor.u32 1.1754944e-38, %v1026_v14  ;;  %vm1025_vm3 = vcmp.eq.f32.partialorder %v1024_v16, 8.507059e+37 }
 0x489   : > { %v1008_v39 = vpop.xlane.xlu0 %1007 }
 0x48a   : > { %v1040_v8 = vand.u32 2147483648, %v1008_v39  ;;  %vm1034_vm11 = vweird.f32 %v1008_v39  ;;  %v1038_v12 = vand.u32 2147483647, %v1008_v39 }
 0x48c   : > { %v1041_v19 = vor.u32 1.1754944e-38, %v1040_v8  ;;  %vm1039_vm15 = vcmp.eq.f32.partialorder %v1038_v12, 8.507059e+37 }
 0x492   : > { %1295 = vrot.lane.b32.xlu2 %v3284_v58, %s3056_s2 }
 0x494   : > { %v1199_v41 = vpop.xlane.xlu0 %1198 }
 0x495   : > { %v1209_v42 = vsub.f32 %v3444_v5, %v1199_v41 }
 0x497   : > { %v1213_v43 = vmul.f32 1.442695, %v1209_v42 }
 0x499   : > { %2703 = vpow2.f32 %v1213_v43 }
 0x49a   : > { %1594 = vrot.lane.b32.xlu2 %v3272_v40, %s3057_s9  ;;  %2705 = vrcp.f32 %v1008_v39 }
 0x49b   : > { %2707 = vrcp.f32 %v1005_v34 }
 0x49c   : > { %v1202_v50 = vpop.xlane.xlu2 %1201 }
 0x49d   : > { %v1210_v36 = vsub.f32 %v3448_v9, %v1202_v50 }
 0x49f   : > { %v3510_v44 = vpop.eup %2703  ;;  %v1215_v46 = vmul.f32 1.442695, %v1210_v36 }
 0x4a0   : > { %v1221_v49 = vsel %vm355_vm0, %v3510_v44, 0.0  ;;  %v2706_v5 = vpop.eup %2705 }
 0x4a1   : > { %2709 = vpow2.f32 %v1215_v46  ;;  %1222 = vadd.xlane.f32.xlu0 %v1221_v49  ;;  %v2708_v51 = vpop.eup %2707  ;;  %v1030_v55 = vmul.f32 %v2706_v5, %v1008_v39  ;;  %vm1035_vm9 = vweird.f32 %v2706_v5  ;;  %v1341_v39 = vsel %vm879_vm2, %v477_v38, 0 }
 0x4a2   : > { %1372 = vrot.lane.b32.xlu2 %v3280_v52, %s3058_s29  ;;  %v1016_v56 = vmul.f32 %v2708_v51, %v1005_v34  ;;  %vm1021_vm10 = vweird.f32 %v2708_v51  ;;  %vm1036_vm12 = vmor %vm1034_vm11, %vm1035_vm9 }
 0x4a3   : > { %v1031_v59 = vsub.f32 1.0, %v1030_v55  ;;  %vm1022_vm14 = vmor %vm1020_vm13, %vm1021_vm10 }
 0x4a4   : > { %v1017_v25 = vsub.f32 1.0, %v1016_v56  ;;  %v1205_v3 = vpop.xlane.xlu0 %1204 }
 0x4a5   : > { %v1032_v63 = vmul.f32 %v2706_v5, %v1031_v59  ;;  %v1211_v35 = vsub.f32 %v3452_v13, %v1205_v3 }
 0x4a6   : > { %v1018_v47 = vmul.f32 %v2708_v51, %v1017_v25 }
 0x4a7   : > { %v3516_v54 = vpop.eup %2709  ;;  %v1033_v6 = vadd.f32 %v2706_v5, %v1032_v63  ;;  %v1217_v37 = vmul.f32 1.442695, %v1211_v35 }
 0x4a8   : > { %v1224_v9 = vsel %vm355_vm0, %v3516_v54, 0.0  ;;  %v1019_v11 = vadd.f32 %v2708_v51, %v1018_v47 }
 0x4a9   : > { %1225 = vadd.xlane.f32.xlu0 %v1224_v9  ;;  %v1037_v17 = vsel %vm1036_vm12, %v2706_v5, %v1033_v6 }
 0x4aa   : > { %1370 = vrot.lane.b32.xlu2 %v3284_v58, %s3058_s29  ;;  %v1023_v26 = vsel %vm1022_vm14, %v2708_v51, %v1019_v11  ;;  %v1042_v24 = vsel %vm1039_vm15, %v1041_v19, %v1037_v17 }
 0x4ab   : > { %v1028_v27 = vsel %vm1025_vm3, %v1027_v22, %v1023_v26  ;;  %v1072_v30 = vmul.f32 %v3438_v2, %v1042_v24  ;;  %v475_v2 = vld [vmem:[#allocation8 + $0x4] sm:$0xf] }
 0x4ac   : > { %v1208_v60 = vpop.xlane.xlu2 %1207  ;;  %v1071_v31 = vmul.f32 %v3432_v61, %v1028_v27  ;;  %v881_v28 = vsel %vm879_vm2, %v475_v2, 0 }
 0x4ad   : > { %v1212_v62 = vsub.f32 %v3456_v15, %v1208_v60  ;;  %890 = vmatpush.bf16.msrb.mxu2 %v881_v28 }
 0x4ae   : > { %v1075_v21 = vpack.c.bf16 %v1072_v30, %v1071_v31 }
 0x4af   : > { %v1219_v29 = vmul.f32 1.442695, %v1212_v62 }
 0x4b1   : > { %2711 = vpow2.f32 %v1219_v29 }
 0x4b2   : > { %1584 = vrot.lane.b32.xlu2 %v3288_v1, %s3057_s9  ;;  %2713 = vpow2.f32 %v1217_v37 }
 0x4b4   : > { %v1082_v10 = vpop.permute.xlu2 %1081 }
 0x4b5   : > { %1100 = vmatpush.bf16.msra.mxu3 %v1082_v10 }
 0x4b7   : > { %v3525_v15 = vpop.eup %2711  ;;  %v1080_v18 = vpop.permute.xlu0 %1079 }
 0x4b8   : > { %v1230_v20 = vsel %vm355_vm0, %v3525_v15, 0.0  ;;  %v3543_v34 = vpop.eup %2713 }
 0x4b9   : > { %1101 = vmatpush.bf16.msra.mxu3 %v1080_v18  ;;  %1231 = vadd.xlane.f32.xlu1 %v1230_v20  ;;  %v1227_v41 = vsel %vm355_vm0, %v3543_v34, 0.0 }
 0x4bd   : > { %1297 = vrot.lane.b32.xlu0 %v3280_v52, %s3056_s2 }
 0x4bf   : > { %v1078_v33 = vpop.permute.xlu0 %1077 }
 0x4c0   : > { %1102 = vmatpush.bf16.msra.mxu3 %v1078_v33 }
 0x4c3   : > { %2460 = vmatmul.msk.bf16.vlgmr.msra.gmra.mxu3 %vm355_vm0, %v1075_v21 }
 0x4c4   : > { %1350 = vmatpush.bf16.msrb.mxu3 %v1341_v39 }
 0x4c7   : > { %v1300_v23 = vpop.permute.xlu0 %1299 }
 0x4c8   : > { %1318 = vmatpush.bf16.msrb.mxu1 %v1300_v23  ;;  %v476_v23 = vld [vmem:[#allocation8 + $0x8] sm:$0xf] }
 0x4c9   : > { %v1123_v37 = vsel %vm879_vm2, %v476_v23, 0 }
 0x4ca   : > { %1132 = vmatpush.bf16.msra.mxu2 %v1123_v37 }
 0x4d2   : > { %1376 = vrot.lane.b32.xlu1 %v3272_v40, %s3058_s29 }
 0x4d4   : > { %v1011_v61 = vpop.xlane.xlu1 %1010 }
 0x4d5   : > { %2715 = vrcp.f32 %v1011_v61  ;;  %v1054_v9 = vand.u32 2147483648, %v1011_v61  ;;  %vm1048_vm5 = vweird.f32 %v1011_v61  ;;  %v1052_v56 = vand.u32 2147483647, %v1011_v61 }
 0x4d7   : > { %v1055_v29 = vor.u32 1.1754944e-38, %v1054_v9  ;;  %vm1053_vm8 = vcmp.eq.f32.partialorder %v1052_v56, 8.507059e+37 }
 0x4da   : > { %1592 = vrot.lane.b32.xlu1 %v3276_v45, %s3057_s9 }
 0x4db   : > { %v2716_v13 = vpop.eup %2715 }
 0x4dc   : > { %v1044_v42 = vmul.f32 %v2716_v13, %v1011_v61  ;;  %vm1049_vm4 = vweird.f32 %v2716_v13 }
 0x4dd   : > { %vm3553_vm6 = vmor %vm1048_vm5, %vm1049_vm4 }
 0x4de   : > { %v1045_v43 = vsub.f32 1.0, %v1044_v42 }
 0x4e0   : > { %v1046_v36 = vmul.f32 %v2716_v13, %v1045_v43 }
 0x4e2   : > { %1590 = vrot.lane.b32.xlu1 %v3280_v52, %s3057_s9  ;;  %v1047_v49 = vadd.f32 %v2716_v13, %v1046_v36 }
 0x4e4   : > { %v1051_v3 = vsel %vm3553_vm6, %v2716_v13, %v1047_v49 }
 0x4e5   : > { %v1056_v8 = vsel %vm1053_vm8, %v1055_v29, %v1051_v3 }
 0x4e6   : > { %v1073_v18 = vmul.f32 %v3472_v32, %v1056_v8 }
 0x4e7   : > { %1228 = vadd.xlane.f32.xlu0 %v1227_v41 }
 0x4ea   : > { %1588 = vrot.lane.b32.xlu1 %v3284_v58, %s3057_s9 }
 0x4ed   : > { %v1014_v50 = vpop.xlane.xlu2 %1013 }
 0x4ee   : > { %2717 = vrcp.f32 %v1014_v50  ;;  %v1068_v25 = vand.u32 2147483648, %v1014_v50  ;;  %v1066_v63 = vand.u32 2147483647, %v1014_v50  ;;  %vm1062_vm9 = vweird.f32 %v1014_v50 }
 0x4f0   : > { %v1069_v6 = vor.u32 1.1754944e-38, %v1068_v25  ;;  %vm1067_vm11 = vcmp.eq.f32.partialorder %v1066_v63, 8.507059e+37 }
 0x4f2   : > { %1368 = vrot.lane.b32.xlu1 %v3292_v7, %s3058_s29 }
 0x4f4   : > { %v2718_v46 = vpop.eup %2717 }
 0x4f5   : > { %v1058_v5 = vmul.f32 %v2718_v46, %v1014_v50  ;;  %v3551_v51 = vpop.permute.xlu2 %1295  ;;  %v861_v55 = vpop.f32.mrf.mxu3  ;;  %vm1063_vm7 = vweird.f32 %v2718_v46 }
 0x4f6   : > { %vm1064_vm10 = vmor %vm1062_vm9, %vm1063_vm7 }
 0x4f7   : > { %v1059_v59 = vsub.f32 1.0, %v1058_v5 }
 0x4f9   : > { %v1060_v62 = vmul.f32 %v2718_v46, %v1059_v59 }
 0x4fa   : > { %1737 = vrot.lane.b32.xlu1 %v3272_v40, %s3059_s11 }
 0x4fb   : > { %v1061_v47 = vadd.f32 %v2718_v46, %v1060_v62  ;;  %1374 = vrot.lane.b32.xlu0 %v3276_v45, %s3058_s29 }
 0x4fd   : > { %v1595_v10 = vpop.permute.xlu2 %1594  ;;  %v863_v11 = vpop.f32.mrf.mxu3  ;;  %v1065_v12 = vsel %vm1064_vm10, %v2718_v46, %v1061_v47 }
 0x4fe   : > { %v1612_v14 = vsel %vm512_vm1, %v1595_v10, 0  ;;  %v871_v16 = vpack.c.bf16 %v863_v11, %v861_v55  ;;  %v1070_v17 = vsel %vm1067_vm11, %v1069_v6, %v1065_v12 }
 0x4ff   : > { %1618 = vmatpush.bf16.xpose.msra.mxu3 %v1612_v14  ;;  %v1074_v19 = vmul.f32 %v3494_v48, %v1070_v17 }
 0x500   : > { %2454 = vmatmul.msk.bf16.vlgmr.msrb.gmra.mxu2 %vm512_vm1, %v871_v16 }
 0x501   : > { %v1076_v20 = vpack.c.bf16 %v1074_v19, %v1073_v18 }
 0x503   : > { %1366 = vrot.lane.b32.xlu0 %v3288_v1, %s3058_s29  ;;  %2461 = vmatmul.msk.bf16.gmra.mxu3 %vm355_vm0, %v1076_v20  ;;  %s3948_s29 = sld [smem:[#allocation24_spill]] }
 0x505   : > { %v866_v26 = vpop.f32.mrf.mxu3 }
 0x509   : > { %s2269_s24 = scalar_lea.hbm %s3948_s29, %s2497_s15  ;;  %s2931_s5 = scalar_lea.hbm %s3948_s29, 64 }
 0x50b   : > { %1586 = vrot.lane.b32.xlu0 %v3292_v7, %s3057_s9 }
 0x50d   : > { %v868_v22 = vpop.f32.mrf.mxu3 }
 0x50e   : > { %v872_v24 = vpack.c.bf16 %v868_v22, %v866_v26 }
 0x510   : > { %2455 = vmatmul.msk.bf16.gmra.mxu2 %vm512_vm1, %v872_v24 }
 0x513   : > { %1519 = vrot.lane.b32.xlu0 %v3272_v40, %s3060_s14 }
 0x514   : > { %v1223_v32 = vpop.xlane.xlu0 %1222 }
 0x515   : > { %2719 = vrcp.f32 %v1223_v32  ;;  %v1244_v13 = vand.u32 2147483648, %v1223_v32  ;;  %vm1238_vm15 = vweird.f32 %v1223_v32  ;;  %v1242_v42 = vand.u32 2147483647, %v1223_v32 }
 0x517   : > { %v1245_v46 = vor.u32 1.1754944e-38, %v1244_v13  ;;  %vm1243_vm6 = vcmp.eq.f32.partialorder %v1242_v42, 8.507059e+37 }
 0x51b   : > { %v2720_v48 = vpop.eup %2719 }
 0x51c   : > { %v1226_v27 = vpop.xlane.xlu0 %1225  ;;  %v1234_v30 = vmul.f32 %v2720_v48, %v1223_v32  ;;  %vm1239_vm13 = vweird.f32 %v2720_v48 }
 0x51d   : > { %2721 = vrcp.f32 %v1226_v27  ;;  %v1258_v61 = vand.u32 2147483648, %v1226_v27  ;;  %v1256_v39 = vand.u32 2147483647, %v1226_v27  ;;  %vm1252_vm14 = vweird.f32 %v1226_v27  ;;  %vm1240_vm4 = vmor %vm1238_vm15, %vm1239_vm13 }
 0x51e   : > { %v1235_v31 = vsub.f32 1.0, %v1234_v30 }
 0x51f   : > { %v1259_v50 = vor.u32 1.1754944e-38, %v1258_v61  ;;  %vm1257_vm5 = vcmp.eq.f32.partialorder %v1256_v39, 8.507059e+37  ;;  %v1373_v39 = vpop.permute.xlu2 %1372 }
 0x520   : > { %v1236_v35 = vmul.f32 %v2720_v48, %v1235_v31  ;;  %v1388_v42 = vsel %vm512_vm1, %v1373_v39, 0 }
 0x522   : > { %v1237_v38 = vadd.f32 %v2720_v48, %v1236_v35 }
 0x523   : > { %v2722_v33 = vpop.eup %2721 }
 0x524   : > { %v1248_v21 = vmul.f32 %v2722_v33, %v1226_v27  ;;  %vm1253_vm12 = vweird.f32 %v2722_v33  ;;  %v1241_v36 = vsel %vm1240_vm4, %v2720_v48, %v1237_v38 }
 0x525   : > { %vm1254_vm3 = vmor %vm1252_vm14, %vm1253_vm12  ;;  %v1246_v55 = vsel %vm1243_vm6, %v1245_v46, %v1241_v36 }
 0x526   : > { %v1249_v2 = vsub.f32 1.0, %v1248_v21  ;;  %v1289_v56 = vmul.f32 %v3510_v44, %v1246_v55 }
 0x528   : > { %v1250_v28 = vmul.f32 %v2722_v33, %v1249_v2 }
 0x52a   : > { %v1251_v41 = vadd.f32 %v2722_v33, %v1250_v28 }
 0x52c   : > { %v1255_v43 = vsel %vm1254_vm3, %v2722_v33, %v1251_v41  ;;  %v1232_v60 = vpop.xlane.xlu1 %1231 }
 0x52d   : > { %v1260_v49 = vsel %vm1257_vm5, %v1259_v50, %v1255_v43  ;;  %2723 = vrcp.f32 %v1232_v60  ;;  %v1286_v20 = vand.u32 2147483648, %v1232_v60  ;;  %vm1280_vm8 = vweird.f32 %v1232_v60  ;;  %v1371_v43 = vpop.permute.xlu2 %1370 }
 0x52e   : > { %v1290_v9 = vmul.f32 %v3516_v54, %v1260_v49  ;;  %v1284_v26 = vand.u32 2147483647, %v1232_v60  ;;  %v1385_v36 = vsel %vm512_vm1, %v1371_v43, 0 }
 0x52f   : > { %v1298_v5 = vpop.permute.xlu0 %1297  ;;  %v1287_v30 = vor.u32 1.1754944e-38, %v1286_v20 }
 0x530   : > { %1319 = vmatpush.bf16.msrb.mxu1 %v1298_v5  ;;  %v1293_v59 = vpack.c.bf16 %v1290_v9, %v1289_v56  ;;  %vm1285_vm11 = vcmp.eq.f32.partialorder %v1284_v26, 8.507059e+37 }
 0x533   : > { %v2724_v44 = vpop.eup %2723 }
 0x534   : > { %1320 = vmatpush.bf16.msrb.mxu1 %v3551_v51  ;;  %v1276_v8 = vmul.f32 %v2724_v44, %v1232_v60  ;;  %vm1281_vm7 = vweird.f32 %v2724_v44 }
 0x535   : > { %vm1282_vm9 = vmor %vm1280_vm8, %vm1281_vm7 }
 0x536   : > { %v1277_v10 = vsub.f32 1.0, %v1276_v8 }
 0x537   : > { %2466 = vmatmul.msk.bf16.vlgmr.msrb.gmra.mxu1 %vm355_vm0, %v1293_v59 }
 0x538   : > { %v1278_v16 = vmul.f32 %v2724_v44, %v1277_v10  ;;  %v1585_v10 = vpop.permute.xlu2 %1584 }
 0x53a   : > { %v1279_v18 = vadd.f32 %v2724_v44, %v1278_v16 }
 0x53c   : > { %v1283_v27 = vsel %vm1282_vm9, %v2724_v44, %v1279_v18 }
 0x53d   : > { %v1288_v21 = vsel %vm1285_vm11, %v1287_v30, %v1283_v27 }
 0x53e   : > { %v1292_v2 = vmul.f32 %v3525_v15, %v1288_v21 }
 0x544   : > { %v1377_v25 = vpop.permute.xlu1 %1376 }
 0x545   : > { %v1394_v62 = vsel %vm512_vm1, %v1377_v25, 0 }
 0x546   : > { %v1104_v63 = vpop.f32.mrf.mxu3  ;;  %1400 = vmatpush.bf16.xpose.msrb.mxu2 %v1394_v62 }
 0x54c   : > { %v1593_v3 = vpop.permute.xlu1 %1592 }
 0x54d   : > { %v1609_v29 = vsel %vm512_vm1, %v1593_v3, 0 }
 0x54e   : > { %v1106_v47 = vpop.f32.mrf.mxu3  ;;  %1619 = vmatpush.bf16.xpose.msra.mxu3 %v1609_v29 }
 0x54f   : > { %v1114_v54 = vpack.c.bf16 %v1106_v47, %v1104_v63 }
 0x551   : > { %2462 = vmatmul.msk.bf16.vlgmr.msra.gmra.mxu2 %vm512_vm1, %v1114_v54 }
 0x554   : > { %v1591_v51 = vpop.permute.xlu1 %1590 }
 0x555   : > { %v1606_v6 = vsel %vm512_vm1, %v1591_v51, 0 }
 0x556   : > { %1620 = vmatpush.bf16.xpose.msra.mxu3 %v1606_v6 }
 0x55a   : > { %v1229_v11 = vpop.xlane.xlu0 %1228 }
 0x55b   : > { %2725 = vrcp.f32 %v1229_v11  ;;  %v1272_v24 = vand.u32 2147483648, %v1229_v11  ;;  %v1270_v48 = vand.u32 2147483647, %v1229_v11  ;;  %vm1266_vm12 = vweird.f32 %v1229_v11 }
 0x55c   : > { %v1589_v12 = vpop.permute.xlu1 %1588 }
 0x55d   : > { %v1603_v14 = vsel %vm512_vm1, %v1589_v12, 0  ;;  %v1273_v33 = vor.u32 1.1754944e-38, %v1272_v24  ;;  %vm1271_vm14 = vcmp.eq.f32.partialorder %v1270_v48, 8.507059e+37 }
 0x55e   : > { %1621 = vmatpush.bf16.xpose.msra.mxu3 %v1603_v14 }
 0x561   : > { %v2726_v17 = vpop.eup %2725 }
 0x562   : > { %v1262_v19 = vmul.f32 %v2726_v17, %v1229_v11  ;;  %vm1267_vm10 = vweird.f32 %v2726_v17 }
 0x563   : > { %vm1268_vm13 = vmor %vm1266_vm12, %vm1267_vm10 }
 0x564   : > { %v1263_v22 = vsub.f32 1.0, %v1262_v19  ;;  %v1369_v13 = vpop.permute.xlu1 %1368 }
 0x566   : > { %v1264_v32 = vmul.f32 %v2726_v17, %v1263_v22 }
 0x568   : > { %v1265_v31 = vadd.f32 %v2726_v17, %v1264_v32 }
 0x56a   : > { %v1269_v23 = vsel %vm1268_vm13, %v2726_v17, %v1265_v31 }
 0x56b   : > { %v1274_v35 = vsel %vm1271_vm14, %v1273_v33, %v1269_v23 }
 0x56c   : > { %v1291_v37 = vmul.f32 %v3543_v34, %v1274_v35  ;;  %v1738_v34 = vpop.permute.xlu1 %1737 }
 0x56d   : > { %v1375_v28 = vpop.permute.xlu0 %1374 }
 0x56e   : > { %v1391_v61 = vsel %vm512_vm1, %v1375_v28, 0  ;;  %v1294_v38 = vpack.c.bf16 %v1292_v2, %v1291_v37 }
 0x56f   : > { %1401 = vmatpush.bf16.xpose.msrb.mxu2 %v1391_v61 }
 0x570   : > { %2467 = vmatmul.msk.bf16.gmra.mxu1 %vm355_vm0, %v1294_v38 }
 0x575   : > { %v1367_v41 = vpop.permute.xlu0 %1366 }
 0x577   : > { %1402 = vmatpush.bf16.xpose.msrb.mxu2 %v1388_v42 }
 0x57d   : > { %v1587_v50 = vpop.permute.xlu0 %1586 }
 0x57f   : > { %1403 = vmatpush.bf16.xpose.msrb.mxu2 %v1385_v36 }
 0x583   : > { %v892_v55 = vpop.f32.mrf.mxu2 }
 0x584   : > { %v921_v63 = vadd.f32 %v3426_v53, %v892_v55 }
 0x585   : > { %v1520_v15 = vpop.permute.xlu0 %1519 }
 0x586   : > { %v1109_v46 = vpop.f32.mrf.mxu3  ;;  %1535 = vmatpush.bf16.msrb.mxu0 %v1520_v15 }
 0x587   : > { %1753 = vmatpush.bf16.msra.mxu2 %v1738_v34 }
 0x58b   : > { %v894_v56 = vpop.f32.mrf.mxu2 }
 0x58c   : > { %v923_v47 = vadd.f32 %v3428_v57, %v894_v56 }
 0x58e   : > { %v1111_v49 = vpop.f32.mrf.mxu3 }
 0x58f   : > { %v1115_v5 = vpack.c.bf16 %v1111_v49, %v1109_v46 }
 0x591   : > { %2463 = vmatmul.msk.bf16.gmra.mxu2 %vm512_vm1, %v1115_v5 }
 0x593   : > { %v897_v25 = vpop.f32.mrf.mxu2 }
 0x594   : > { %v926_v11 = vadd.f32 %v3436_v0, %v897_v25 }
 0x59b   : > { %v899_v62 = vpop.f32.mrf.mxu2 }
 0x59c   : > { %v928_v53 = vadd.f32 %v3442_v4, %v899_v62 }
 0x5a1   : > { %2470 = vmatmul.msk.bf16.vlgmr.msrb.gmra.mxu2 %vm512_vm1, %v1367_v41 }
 0x5b1   : > { %2471 = vmatmul.msk.bf16.gmra.mxu2 %vm512_vm1, %v1369_v13 }
 0x5b4   : > { %v1322_v9 = vpop.f32.mrf.mxu1 }
 0x5bc   : > { %v1324_v59 = vpop.f32.mrf.mxu1 }
 0x5bd   : > { %v1332_v60 = vpack.c.bf16 %v1324_v59, %v1322_v9 }
 0x5bf   : > { %2468 = vmatmul.msk.bf16.vlgmr.msrb.gmra.mxu3 %vm512_vm1, %v1332_v60 }
 0x5d4   : > { %v1134_v3 = vpop.f32.mrf.mxu2 }
 0x5d5   : > { %v1144_v29 = vadd.f32 %v1134_v3, %v921_v63 }
 0x5dc   : > { %v1136_v54 = vpop.f32.mrf.mxu2 }
 0x5dd   : > { %v1145_v44 = vadd.f32 %v1136_v54, %v923_v47 }
 0x5ed   : > { %v1327_v51 = vpop.f32.mrf.mxu1 }
 0x5f5   : > { %v1329_v6 = vpop.f32.mrf.mxu1 }
 0x5f6   : > { %v1333_v8 = vpack.c.bf16 %v1329_v6, %v1327_v51 }
 0x5f8   : > { %2469 = vmatmul.msk.bf16.gmra.mxu3 %vm512_vm1, %v1333_v8 }
 0x608   : > { %2476 = vmatmul.msk.bf16.vlgmr.msra.gmra.mxu3 %vm512_vm1, %v1585_v10 }
 0x614   : > { %v1139_v12 = vpop.f32.mrf.mxu2 }
 0x615   : > { %v1146_v14 = vadd.f32 %v1139_v12, %v926_v11 }
 0x618   : > { %2477 = vmatmul.msk.bf16.gmra.mxu3 %vm512_vm1, %v1587_v50 }
 0x61c   : > { %v1141_v16 = vpop.f32.mrf.mxu2 }
 0x61d   : > { %v1147_v57 = vadd.f32 %v1141_v16, %v928_v53 }
 0x624   : > { %v1405_v17 = vpop.f32.mrf.mxu2 }
 0x625   : > { %v1415_v18 = vsel %vm355_vm0, %v1405_v17, -inf }
 0x626   : > { %1416 = vmax.xlane.f32.xlu2 %v1415_v18 }
 0x62c   : > { %v1407_v19 = vpop.f32.mrf.mxu2 }
 0x62d   : > { %v1418_v20 = vsel %vm355_vm0, %v1407_v19, -inf }
 0x62e   : > { %1419 = vmax.xlane.f32.xlu1 %v1418_v20 }
 0x634   : > { %v1410_v26 = vpop.f32.mrf.mxu2 }
 0x635   : > { %v1421_v22 = vsel %vm355_vm0, %v1410_v26, -inf }
 0x636   : > { %1422 = vmax.xlane.f32.xlu1 %v1421_v22 }
 0x63c   : > { %v1412_v0 = vpop.f32.mrf.mxu2 }
 0x63d   : > { %v1424_v24 = vsel %vm355_vm0, %v1412_v0, -inf }
 0x63e   : > { %1425 = vmax.xlane.f32.xlu2 %v1424_v24 }
 0x642   : > { %v1352_v32 = vpop.f32.mrf.mxu3 }
 0x643   : > { %v3606_v4 = vadd.f32 %v1352_v32, %v1144_v29 }
 0x64a   : > { %v1354_v48 = vpop.f32.mrf.mxu3 }
 0x64b   : > { %v3608_v27 = vadd.f32 %v1354_v48, %v1145_v44 }
 0x67b   : > { %v1357_v30 = vpop.f32.mrf.mxu3 }
 0x67c   : > { %v3610_v31 = vadd.f32 %v1357_v30, %v1146_v14 }
 0x683   : > { %v1359_v33 = vpop.f32.mrf.mxu3 }
 0x684   : > { %v3612_v21 = vadd.f32 %v1359_v33, %v1147_v57 }
 0x68b   : > { %v3614_v23 = vpop.f32.mrf.mxu3 }
 0x68c   : > { %v1633_v9 = vsel %vm355_vm0, %v3614_v23, -inf }
 0x693   : > { %v1625_v35 = vpop.f32.mrf.mxu3 }
 0x694   : > { %v1636_v49 = vsel %vm355_vm0, %v1625_v35, -inf }
 0x699   : > { %v1417_v37 = vpop.xlane.xlu2 %1416 }
 0x69a   : > { %v1427_v2 = vsub.f32 %v1405_v17, %v1417_v37 }
 0x69b   : > { %v3616_v28 = vpop.f32.mrf.mxu3 }
 0x69c   : > { %v1431_v61 = vmul.f32 1.442695, %v1427_v2  ;;  %v1639_v3 = vsel %vm355_vm0, %v3616_v28, -inf }
 0x69e   : > { %2727 = vpow2.f32 %v1431_v61 }
 0x6a1   : > { %v1420_v38 = vpop.xlane.xlu1 %1419 }
 0x6a2   : > { %v1428_v39 = vsub.f32 %v1407_v19, %v1420_v38 }
 0x6a3   : > { %v1630_v13 = vpop.f32.mrf.mxu3 }
 0x6a4   : > { %v3618_v41 = vpop.eup %2727  ;;  %v1433_v42 = vmul.f32 1.442695, %v1428_v39  ;;  %v1642_v43 = vsel %vm355_vm0, %v1630_v13, -inf }
 0x6a5   : > { %1643 = vmax.xlane.f32.xlu1 %v1642_v43  ;;  %v1439_v50 = vsel %vm355_vm0, %v3618_v41, 0.0 }
 0x6a6   : > { %2729 = vpow2.f32 %v1433_v42  ;;  %1440 = vadd.xlane.f32.xlu2 %v1439_v50 }
 0x6a9   : > { %v1423_v36 = vpop.xlane.xlu1 %1422 }
 0x6aa   : > { %v1429_v34 = vsub.f32 %v1410_v26, %v1423_v36 }
 0x6ac   : > { %v3623_v15 = vpop.eup %2729  ;;  %v1435_v46 = vmul.f32 1.442695, %v1429_v34 }
 0x6ad   : > { %v1442_v5 = vsel %vm355_vm0, %v3623_v15, 0.0 }
 0x6ae   : > { %2731 = vpow2.f32 %v1435_v46  ;;  %1637 = vmax.xlane.f32.xlu2 %v1636_v49  ;;  %1443 = vadd.xlane.f32.xlu0 %v1442_v5 }
 0x6b1   : > { %v1426_v59 = vpop.xlane.xlu2 %1425 }
 0x6b2   : > { %v1430_v60 = vsub.f32 %v1412_v0, %v1426_v59 }
 0x6b4   : > { %v3628_v55 = vpop.eup %2731  ;;  %v1437_v25 = vmul.f32 1.442695, %v1430_v60 }
 0x6b5   : > { %v1445_v56 = vsel %vm355_vm0, %v3628_v55, 0.0 }
 0x6b6   : > { %1634 = vmax.xlane.f32.xlu0 %v1633_v9  ;;  %1446 = vadd.xlane.f32.xlu1 %v1445_v56  ;;  %2733 = vpow2.f32 %v1437_v25 }
 0x6bc   : > { %v3640_v62 = vpop.eup %2733 }
 0x6bd   : > { %v1448_v63 = vsel %vm355_vm0, %v3640_v62, 0.0 }
 0x6c6   : > { %1517 = vrot.lane.b32.xlu2 %v3276_v45, %s3060_s14 }
 0x6ca   : > { %1735 = vrot.lane.b32.xlu0 %v3276_v45, %s3059_s11 }
 0x6d2   : > { %1515 = vrot.lane.b32.xlu0 %v3280_v52, %s3060_s14 }
 0x6ef   : > { %1449 = vadd.xlane.f32.xlu2 %v1448_v63 }
 0x6fc   : > { %1640 = vmax.xlane.f32.xlu0 %v1639_v3 }
 0x710   : > { %1733 = vrot.lane.b32.xlu0 %v3280_v52, %s3059_s11 }
 0x718   : > { %v1644_v54 = vpop.xlane.xlu1 %1643 }
 0x719   : > { %v1441_v29 = vpop.xlane.xlu2 %1440  ;;  %v1648_v11 = vsub.f32 %v1630_v13, %v1644_v54 }
 0x71a   : > { %2735 = vrcp.f32 %v1441_v29  ;;  %v1462_v20 = vand.u32 2147483648, %v1441_v29  ;;  %vm1456_vm3 = vweird.f32 %v1441_v29  ;;  %v1460_v22 = vand.u32 2147483647, %v1441_v29 }
 0x71b   : > { %v1655_v16 = vmul.f32 1.442695, %v1648_v11 }
 0x71c   : > { %v1463_v2 = vor.u32 1.1754944e-38, %v1462_v20  ;;  %vm1461_vm6 = vcmp.eq.f32.partialorder %v1460_v22, 8.507059e+37 }
 0x720   : > { %v2736_v47 = vpop.eup %2735 }
 0x721   : > { %v1452_v44 = vmul.f32 %v2736_v47, %v1441_v29  ;;  %v1638_v51 = vpop.xlane.xlu2 %1637  ;;  %v1444_v6 = vpop.xlane.xlu0 %1443  ;;  %vm1457_vm15 = vweird.f32 %v2736_v47 }
 0x722   : > { %v1646_v8 = vsub.f32 %v1625_v35, %v1638_v51  ;;  %2737 = vrcp.f32 %v1444_v6  ;;  %vm1458_vm4 = vmor %vm1456_vm3, %vm1457_vm15  ;;  %v1474_v32 = vand.u32 2147483647, %v1444_v6  ;;  %v1476_v48 = vand.u32 2147483648, %v1444_v6 }
 0x723   : > { %v1453_v10 = vsub.f32 1.0, %v1452_v44  ;;  %vm1470_vm7 = vweird.f32 %v1444_v6 }
 0x724   : > { %v1651_v12 = vmul.f32 1.442695, %v1646_v8  ;;  %v1477_v38 = vor.u32 1.1754944e-38, %v1476_v48  ;;  %vm1475_vm9 = vcmp.eq.f32.partialorder %v1474_v32, 8.507059e+37 }
 0x725   : > { %v1454_v14 = vmul.f32 %v2736_v47, %v1453_v10 }
 0x726   : > { %2739 = vpow2.f32 %v1651_v12 }
 0x727   : > { %v1455_v57 = vadd.f32 %v2736_v47, %v1454_v14  ;;  %2741 = vpow2.f32 %v1655_v16 }
 0x728   : > { %v2738_v53 = vpop.eup %2737 }
 0x729   : > { %v1466_v17 = vmul.f32 %v2738_v53, %v1444_v6  ;;  %v1518_v18 = vpop.permute.xlu2 %1517  ;;  %v1635_v19 = vpop.xlane.xlu0 %1634  ;;  %v1459_v33 = vsel %vm1458_vm4, %v2736_v47, %v1455_v57  ;;  %vm1471_vm5 = vweird.f32 %v2738_v53 }
 0x72a   : > { %v1645_v26 = vsub.f32 %v3614_v23, %v1635_v19  ;;  %1536 = vmatpush.bf16.msrb.mxu0 %v1518_v18  ;;  %v1464_v61 = vsel %vm1461_vm6, %v1463_v2, %v1459_v33  ;;  %vm1472_vm8 = vmor %vm1470_vm7, %vm1471_vm5 }
 0x72b   : > { %v1467_v0 = vsub.f32 1.0, %v1466_v17  ;;  %v3656_v43 = vmul.f32 %v3618_v41, %v1464_v61 }
 0x72c   : > { %v3649_v24 = vpop.eup %2739  ;;  %v1649_v30 = vmul.f32 1.442695, %v1645_v26 }
 0x72d   : > { %v1468_v35 = vmul.f32 %v2738_v53, %v1467_v0  ;;  %v1660_v37 = vsel %vm355_vm0, %v3649_v24, 0.0  ;;  %v3653_v13 = vpop.eup %2741 }
 0x72e   : > { %2743 = vpow2.f32 %v1649_v30  ;;  %1661 = vadd.xlane.f32.xlu2 %v1660_v37  ;;  %v1666_v46 = vsel %vm355_vm0, %v3653_v13, 0.0 }
 0x72f   : > { %v1469_v23 = vadd.f32 %v2738_v53, %v1468_v35 }
 0x731   : > { %v1473_v39 = vsel %vm1472_vm8, %v2738_v53, %v1469_v23  ;;  %v479_v23 = vld [vmem:[#allocation8 + $0x14] sm:$0xf] }
 0x732   : > { %v1478_v42 = vsel %vm1475_vm9, %v1477_v38, %v1473_v39  ;;  %v1777_v39 = vsel %vm879_vm2, %v479_v23, 0 }
 0x733   : > { %v3659_v50 = vmul.f32 %v3623_v15, %v1478_v42 }
 0x734   : > { %v3661_v36 = vpop.eup %2743 }
 0x735   : > { %v1657_v34 = vsel %vm355_vm0, %v3661_v36, 0.0  ;;  %v1511_v49 = vpack.c.bf16 %v3659_v50, %v3656_v43 }
 0x736   : > { %1658 = vadd.xlane.f32.xlu1 %v1657_v34  ;;  %1667 = vadd.xlane.f32.xlu2 %v1666_v46 }
 0x73c   : > { %v1736_v5 = vpop.permute.xlu0 %1735 }
 0x73d   : > { %1754 = vmatpush.bf16.msra.mxu2 %v1736_v5 }
 0x744   : > { %v1516_v41 = vpop.permute.xlu0 %1515 }
 0x745   : > { %1537 = vmatpush.bf16.msrb.mxu0 %v1516_v41 }
 0x74e   : > { %1731 = vrot.lane.b32.xlu2 %v3284_v58, %s3059_s11 }
 0x74f   : > { %1513 = vrot.lane.b32.xlu1 %v3284_v58, %s3060_s14  ;;  %s2272_s14 = sshll.u32 %s2269_s24, 4  ;;  %s2273_s14 = int_to_ptr.hbm [resolvable:$true] %s2272_s14 }
 0x756   : > { %2030 = vrot.lane.b32.xlu2 %v3272_v40, %s3061_s16 }
 0x757   : > { %1810 = vrot.lane.b32.xlu1 %v3276_v45, %s3062_s30 }
 0x75e   : > { %1806 = vrot.lane.b32.xlu2 %v3284_v58, %s3062_s30 }
 0x75f   : > { %2028 = vrot.lane.b32.xlu1 %v3276_v45, %s3061_s16 }
 0x766   : > { %2024 = vrot.lane.b32.xlu2 %v3284_v58, %s3061_s16 }
 0x767   : > { %1802 = vrot.lane.b32.xlu1 %v3288_v1, %s3062_s30 }
 0x76e   : > { %2022 = vrot.lane.b32.xlu2 %v3292_v7, %s3061_s16 }
 0x76f   : > { %v1641_v15 = vpop.xlane.xlu0 %1640  ;;  %1804 = vrot.lane.b32.xlu1 %v3292_v7, %s3062_s30  ;;  %v3690_v7 = vpop.xlane.xlu2 %1449 }
 0x770   : > { %v1647_v9 = vsub.f32 %v3616_v28, %v1641_v15  ;;  %v3693_v28 = vpop.xlane.xlu1 %1446  ;;  %vm1498_vm7 = vweird.f32 %v3690_v7 }
 0x771   : > { %vm1484_vm9 = vweird.f32 %v3693_v28 }
 0x772   : > { %v1653_v56 = vmul.f32 1.442695, %v1647_v9  ;;  %v1502_v9 = vand.u32 2147483647, %v3690_v7 }
 0x774   : > { %2745 = vpow2.f32 %v1653_v56  ;;  %v1490_v56 = vand.u32 2147483648, %v3693_v28 }
 0x776   : > { %1953 = vrot.lane.b32.xlu2 %v3276_v45, %s3063_s12 }
 0x77a   : > { %v3684_v59 = vpop.eup %2745 }
 0x77b   : > { %v1663_v60 = vsel %vm355_vm0, %v3684_v59, 0.0 }
 0x77c   : > { %1664 = vadd.xlane.f32.xlu0 %v1663_v60  ;;  %v1488_v60 = vand.u32 2147483647, %v3693_v28 }
 0x782   : > { %v1734_v25 = vpop.permute.xlu0 %1733 }
 0x783   : > { %1755 = vmatpush.bf16.msra.mxu2 %v1734_v25 }
 0x790   : > { %1812 = vrot.lane.b32.xlu0 %v3272_v40, %s3062_s30 }
 0x798   : > { %1808 = vrot.lane.b32.xlu0 %v3280_v52, %s3062_s30  ;;  %s2925_s30 = sshra.s32 %s2273_s14, 4  ;;  %s2926_s30 = int_to_ptr.hbm [resolvable:$true] %s2925_s30 }
 0x799   : > { %p2932_p0 = scmp.lt.s32.totalorder %s2926_s30, %s3948_s29 }
 0x7a0   : > { %2026 = vrot.lane.b32.xlu0 %v3280_v52, %s3061_s16 }
 0x7a1   : > { %v1662_v63 = vpop.xlane.xlu2 %1661 }
 0x7a2   : > { %2747 = vrcp.f32 %v1662_v63  ;;  %v1694_v12 = vand.u32 2147483648, %v1662_v63  ;;  %vm1688_vm11 = vweird.f32 %v1662_v63 }
 0x7a4   : > { %v1695_v19 = vor.u32 1.1754944e-38, %v1694_v12 }
 0x7a8   : > { %v2748_v3 = vpop.eup %2747  ;;  %2020 = vrot.lane.b32.xlu0 %v3288_v1, %s3061_s16  ;;  %v1692_v1 = vand.u32 2147483647, %v1662_v63  ;;  %s2256_s16 = scalar_lea.sflag [#allocation4], %s306_s13 }
 0x7a9   : > { %v1684_v29 = vmul.f32 %v2748_v3, %v1662_v63  ;;  %v3696_v47 = vpop.xlane.xlu2 %1667  ;;  %v1659_v54 = vpop.xlane.xlu1 %1658  ;;  %vm1689_vm10 = vweird.f32 %v2748_v3  ;;  %v1491_v63 = vor.u32 1.1754944e-38, %v1490_v56 }
 0x7aa   : > { %2749 = vrcp.f32 %v1659_v54  ;;  %vm1690_vm12 = vmor %vm1688_vm11, %vm1689_vm10  ;;  %v1680_v53 = vand.u32 2147483648, %v1659_v54  ;;  %v1678_v18 = vand.u32 2147483647, %v1659_v54  ;;  %vm1693_vm14 = vcmp.eq.f32.partialorder %v1692_v1, 8.507059e+37 }
 0x7ab   : > { %v1685_v44 = vsub.f32 1.0, %v1684_v29  ;;  %2751 = vrcp.f32 %v3690_v7  ;;  %vm1674_vm15 = vweird.f32 %v1659_v54  ;;  %vm1503_vm11 = vcmp.eq.f32.partialorder %v1502_v9, 8.507059e+37 }
 0x7ac   : > { %2753 = vrcp.f32 %v3693_v28  ;;  %v1681_v32 = vor.u32 1.1754944e-38, %v1680_v53  ;;  %vm1679_vm4 = vcmp.eq.f32.partialorder %v1678_v18, 8.507059e+37 }
 0x7ad   : > { %v1686_v51 = vmul.f32 %v2748_v3, %v1685_v44  ;;  %2755 = vrcp.f32 %v3696_v47 }
 0x7af   : > { %v1687_v10 = vadd.f32 %v2748_v3, %v1686_v51 }
 0x7b0   : > { %v2750_v6 = vpop.eup %2749 }
 0x7b1   : > { %v1732_v8 = vpop.permute.xlu2 %1731  ;;  %v1670_v11 = vmul.f32 %v2750_v6, %v1659_v54  ;;  %v2752_v16 = vpop.eup %2751  ;;  %v1691_v57 = vsel %vm1690_vm12, %v2748_v3, %v1687_v10  ;;  %vm1675_vm13 = vweird.f32 %v2750_v6  ;;  %vm1489_vm12 = vcmp.eq.f32.partialorder %v1488_v60, 8.507059e+37 }
 0x7b2   : > { %1756 = vmatpush.bf16.msra.mxu2 %v1732_v8  ;;  %v2754_v20 = vpop.eup %2753  ;;  %v1494_v22 = vmul.f32 %v2752_v16, %v3690_v7  ;;  %v1696_v0 = vsel %vm1693_vm14, %v1695_v19, %v1691_v57  ;;  %vm1676_vm3 = vmor %vm1674_vm15, %vm1675_vm13  ;;  %vm1499_vm5 = vweird.f32 %v2752_v16  ;;  %vm1716_vm14 = vweird.f32 %v3696_v47 }
 0x7b3   : > { %v1671_v14 = vsub.f32 1.0, %v1670_v11  ;;  %v1480_v30 = vmul.f32 %v2754_v20, %v3693_v28  ;;  %v1726_v35 = vmul.f32 %v3649_v24, %v1696_v0  ;;  %vm1485_vm6 = vweird.f32 %v2754_v20  ;;  %vm1500_vm8 = vmor %vm1498_vm7, %vm1499_vm5  ;;  %v478_v28 = vld [vmem:[#allocation8 + $0x10] sm:$0xf]  ;;  %v2756_v10 = vpop.eup %2755 }
 0x7b4   : > { %v1495_v2 = vsub.f32 1.0, %v1494_v22  ;;  %vm1486_vm10 = vmor %vm1484_vm9, %vm1485_vm6  ;;  %v1559_v8 = vsel %vm879_vm2, %v478_v28, 0  ;;  %v1712_v11 = vmul.f32 %v2756_v10, %v3696_v47  ;;  %vm1717_vm13 = vweird.f32 %v2756_v10 }
 0x7b5   : > { %v1672_v17 = vmul.f32 %v2750_v6, %v1671_v14  ;;  %v1481_v38 = vsub.f32 1.0, %v1480_v30  ;;  %1568 = vmatpush.bf16.msra.mxu1 %v1559_v8  ;;  %v1720_v57 = vand.u32 2147483647, %v3696_v47  ;;  %vm1718_vm15 = vmor %vm1716_vm14, %vm1717_vm13 }
 0x7b6   : > { %v1496_v42 = vmul.f32 %v2752_v16, %v1495_v2  ;;  %v1713_v12 = vsub.f32 1.0, %v1712_v11 }
 0x7b7   : > { %v1673_v26 = vadd.f32 %v2750_v6, %v1672_v17  ;;  %v1482_v5 = vmul.f32 %v2754_v20, %v1481_v38 }
 0x7b8   : > { %v1497_v41 = vadd.f32 %v2752_v16, %v1496_v42  ;;  %v1714_v1 = vmul.f32 %v2756_v10, %v1713_v12 }
 0x7b9   : > { %v1677_v48 = vsel %vm1676_vm3, %v2750_v6, %v1673_v26  ;;  %v2031_v46 = vpop.permute.xlu2 %2030  ;;  %v1483_v15 = vadd.f32 %v2754_v20, %v1482_v5 }
 0x7ba   : > { %v1682_v33 = vsel %vm1679_vm4, %v1681_v32, %v1677_v48  ;;  %v2048_v24 = vsel %vm512_vm1, %v2031_v46, 0  ;;  %v1501_v43 = vsel %vm1500_vm8, %v2752_v16, %v1497_v41  ;;  %v1715_v14 = vadd.f32 %v2756_v10, %v1714_v1 }
 0x7bb   : > { %v1725_v37 = vmul.f32 %v3661_v36, %v1682_v33  ;;  %v1504_v36 = vand.u32 2147483648, %v3690_v7  ;;  %v1722_v16 = vand.u32 2147483648, %v3696_v47  ;;  %vm1721_vm4 = vcmp.eq.f32.partialorder %v1720_v57, 8.507059e+37 }
 0x7bc   : > { %v1719_v26 = vsel %vm1718_vm15, %v2756_v10, %v1715_v14 }
 0x7bd   : > { %v1729_v61 = vpack.c.bf16 %v1726_v35, %v1725_v37  ;;  %v1505_v50 = vor.u32 1.1754944e-38, %v1504_v36  ;;  %v1723_v22 = vor.u32 1.1754944e-38, %v1722_v16 }
 0x7bf   : > { %2478 = vmatmul.msk.bf16.vlgmr.msra.gmra.mxu2 %vm355_vm0, %v1729_v61  ;;  %v1506_v3 = vsel %vm1503_vm11, %v1505_v50, %v1501_v43  ;;  %v1724_v48 = vsel %vm1721_vm4, %v1723_v22, %v1719_v26 }
 0x7c0   : > { %v1510_v54 = vmul.f32 %v3640_v62, %v1506_v3  ;;  %v1728_v47 = vmul.f32 %v3653_v13, %v1724_v48 }
 0x7c1   : > { %v1514_v34 = vpop.permute.xlu1 %1513 }
 0x7c2   : > { %1538 = vmatpush.bf16.msrb.mxu0 %v1514_v34 }
 0x7c5   : > { %2472 = vmatmul.msk.bf16.vlgmr.msrb.gmra.mxu0 %vm355_vm0, %v1511_v49  ;;  %v1487_v49 = vsel %vm1486_vm10, %v2754_v20, %v1483_v15 }
 0x7c6   : > { %1786 = vmatpush.bf16.msra.mxu0 %v1777_v39  ;;  %v1492_v29 = vsel %vm1489_vm12, %v1491_v63, %v1487_v49  ;;  %v1807_v39 = vpop.permute.xlu2 %1806 }
 0x7c7   : > { %v1509_v44 = vmul.f32 %v3628_v55, %v1492_v29 }
 0x7c9   : > { %v1811_v25 = vpop.permute.xlu1 %1810  ;;  %v1512_v6 = vpack.c.bf16 %v1510_v54, %v1509_v44 }
 0x7ca   : > { %2054 = vmatpush.bf16.xpose.msrb.mxu0 %v2048_v24  ;;  %v1827_v38 = vsel %vm512_vm1, %v1811_v25, 0 }
 0x7ce   : > { %v2025_v13 = vpop.permute.xlu2 %2024 }
 0x7cf   : > { %v2039_v5 = vsel %vm512_vm1, %v2025_v13, 0 }
 0x7d1   : > { %v2029_v7 = vpop.permute.xlu1 %2028 }
 0x7d2   : > { %v2045_v51 = vsel %vm512_vm1, %v2029_v7, 0 }
 0x7d3   : > { %2055 = vmatpush.bf16.xpose.msrb.mxu0 %v2045_v51 }
 0x7d5   : > { %2473 = vmatmul.msk.bf16.gmra.mxu0 %vm355_vm0, %v1512_v6 }
 0x7d6   : > { %v2023_v7 = vpop.permute.xlu2 %2022 }
 0x7d9   : > { %v1803_v50 = vpop.permute.xlu1 %1802 }
 0x7de   : > { %v1954_v13 = vpop.permute.xlu2 %1953 }
 0x7e1   : > { %v1805_v49 = vpop.permute.xlu1 %1804 }
 0x7ef   : > { %v1665_v62 = vpop.xlane.xlu0 %1664 }
 0x7f0   : > { %2757 = vrcp.f32 %v1665_v62  ;;  %v1708_v18 = vand.u32 2147483648, %v1665_v62  ;;  %v1706_v20 = vand.u32 2147483647, %v1665_v62  ;;  %vm1702_vm5 = vweird.f32 %v1665_v62 }
 0x7f2   : > { %v1709_v32 = vor.u32 1.1754944e-38, %v1708_v18  ;;  %vm1707_vm7 = vcmp.eq.f32.partialorder %v1706_v20, 8.507059e+37 }
 0x7f6   : > { %v2758_v55 = vpop.eup %2757 }
 0x7f7   : > { %v1698_v53 = vmul.f32 %v2758_v55, %v1665_v62  ;;  %vm1703_vm3 = vweird.f32 %v2758_v55 }
 0x7f8   : > { %vm1704_vm6 = vmor %vm1702_vm5, %vm1703_vm3 }
 0x7f9   : > { %v1699_v17 = vsub.f32 1.0, %v1698_v53 }
 0x7fb   : > { %v1700_v19 = vmul.f32 %v2758_v55, %v1699_v17 }
 0x7fd   : > { %v1701_v0 = vadd.f32 %v2758_v55, %v1700_v19 }
 0x7ff   : > { %v1705_v30 = vsel %vm1704_vm6, %v2758_v55, %v1701_v0 }
 0x800   : > { %v1710_v33 = vsel %vm1707_vm7, %v1709_v32, %v1705_v30 }
 0x801   : > { %v1727_v35 = vmul.f32 %v3684_v59, %v1710_v33  ;;  %v1821_v59 = vsel %vm512_vm1, %v1807_v39, 0 }
 0x802   : > { %v1813_v37 = vpop.permute.xlu0 %1812 }
 0x803   : > { %v1830_v2 = vsel %vm512_vm1, %v1813_v37, 0  ;;  %v1730_v23 = vpack.c.bf16 %v1728_v47, %v1727_v35 }
 0x804   : > { %1836 = vmatpush.bf16.xpose.msrb.mxu1 %v1830_v2 }
 0x805   : > { %2479 = vmatmul.msk.bf16.gmra.mxu2 %vm355_vm0, %v1730_v23 }
 0x80a   : > { %v1809_v61 = vpop.permute.xlu0 %1808 }
 0x80b   : > { %v1824_v34 = vsel %vm512_vm1, %v1809_v61, 0 }
 0x80c   : > { %1837 = vmatpush.bf16.xpose.msrb.mxu1 %v1827_v38 }
 0x812   : > { %v2027_v42 = vpop.permute.xlu0 %2026 }
 0x813   : > { %v2042_v46 = vsel %vm512_vm1, %v2027_v42, 0 }
 0x814   : > { %1838 = vmatpush.bf16.xpose.msrb.mxu1 %v1824_v34  ;;  %2056 = vmatpush.bf16.xpose.msrb.mxu0 %v2042_v46 }
 0x81a   : > { %v2021_v54 = vpop.permute.xlu0 %2020 }
 0x81c   : > { %1839 = vmatpush.bf16.xpose.msrb.mxu1 %v1821_v59  ;;  %2057 = vmatpush.bf16.xpose.msrb.mxu0 %v2039_v5 }
 0x842   : > { %v1540_v41 = vpop.f32.mrf.mxu0  ;;  %v1758_v24 = vpop.f32.mrf.mxu2 }
 0x84a   : > { %v1542_v36 = vpop.f32.mrf.mxu0  ;;  %v1760_v9 = vpop.f32.mrf.mxu2 }
 0x84b   : > { %v1550_v15 = vpack.c.bf16 %v1542_v36, %v1540_v41  ;;  %v1768_v56 = vpack.c.bf16 %v1760_v9, %v1758_v24 }
 0x84d   : > { %2474 = vmatmul.msk.bf16.vlgmr.msra.gmra.mxu1 %vm512_vm1, %v1550_v15  ;;  %2480 = vmatmul.msk.bf16.vlgmr.msra.gmra.mxu0 %vm512_vm1, %v1768_v56 }
 0x852   : > { %v1545_v60 = vpop.f32.mrf.mxu0 }
 0x85a   : > { %v1547_v25 = vpop.f32.mrf.mxu0 }
 0x85b   : > { %v1551_v43 = vpack.c.bf16 %v1547_v25, %v1545_v60 }
 0x85d   : > { %2475 = vmatmul.msk.bf16.gmra.mxu1 %vm512_vm1, %v1551_v43 }
 0x86d   : > { %2482 = vmatmul.msk.bf16.vlgmr.msrb.gmra.mxu1 %vm512_vm1, %v1803_v50 }
 0x87d   : > { %2483 = vmatmul.msk.bf16.gmra.mxu1 %vm512_vm1, %v1805_v49 }
 0x888   : > { %v1763_v63 = vpop.f32.mrf.mxu2 }
 0x890   : > { %v1765_v3 = vpop.f32.mrf.mxu2 }
 0x891   : > { %v1769_v29 = vpack.c.bf16 %v1765_v3, %v1763_v63 }
 0x893   : > { %2481 = vmatmul.msk.bf16.gmra.mxu0 %vm512_vm1, %v1769_v29 }
 0x8a3   : > { %2488 = vmatmul.msk.bf16.vlgmr.msrb.gmra.mxu0 %vm512_vm1, %v2021_v54 }
 0x8b3   : > { %2489 = vmatmul.msk.bf16.gmra.mxu0 %vm512_vm1, %v2023_v7 }
 0x8ca   : > { %v1570_v44 = vpop.f32.mrf.mxu1  ;;  %v1788_v6 = vpop.f32.mrf.mxu0 }
 0x8cb   : > { %v1580_v51 = vadd.f32 %v1570_v44, %v3606_v4 }
 0x8cd   : > { %v3745_v28 = vadd.f32 %v1788_v6, %v1580_v51 }
 0x8d2   : > { %v1572_v8 = vpop.f32.mrf.mxu1  ;;  %v1790_v11 = vpop.f32.mrf.mxu0 }
 0x8d3   : > { %v1581_v10 = vadd.f32 %v1572_v8, %v3608_v27 }
 0x8d5   : > { %v3748_v12 = vadd.f32 %v1790_v11, %v1581_v10 }
 0x8da   : > { %v1575_v62 = vpop.f32.mrf.mxu1 }
 0x8db   : > { %v1582_v1 = vadd.f32 %v1575_v62, %v3610_v31 }
 0x8e2   : > { %v1577_v55 = vpop.f32.mrf.mxu1 }
 0x8e3   : > { %v1583_v14 = vadd.f32 %v1577_v55, %v3612_v21 }
 0x8ea   : > { %v1841_v53 = vpop.f32.mrf.mxu1 }
 0x8eb   : > { %v1851_v16 = vsel %vm355_vm0, %v1841_v53, -inf }
 0x8ec   : > { %1852 = vmax.xlane.f32.xlu0 %v1851_v16 }
 0x8f2   : > { %v1843_v4 = vpop.f32.mrf.mxu1 }
 0x8f3   : > { %v1854_v57 = vsel %vm355_vm0, %v1843_v4, -inf }
 0x8f4   : > { %1855 = vmax.xlane.f32.xlu1 %v1854_v57 }
 0x8fa   : > { %v1846_v17 = vpop.f32.mrf.mxu1 }
 0x8fb   : > { %v1857_v32 = vsel %vm355_vm0, %v1846_v17, -inf }
 0x902   : > { %v1848_v18 = vpop.f32.mrf.mxu1 }
 0x903   : > { %v1860_v27 = vsel %vm355_vm0, %v1848_v18, -inf }
 0x904   : > { %1861 = vmax.xlane.f32.xlu2 %v1860_v27 }
 0x90d   : > { %1955 = vrot.lane.b32.xlu1 %v3272_v40, %s3063_s12 }
 0x910   : > { %v1793_v31 = vpop.f32.mrf.mxu0 }
 0x911   : > { %v3757_v19 = vadd.f32 %v1793_v31, %v1582_v1 }
 0x918   : > { %v1795_v21 = vpop.f32.mrf.mxu0 }
 0x919   : > { %v3759_v20 = vadd.f32 %v1795_v21, %v1583_v14 }
 0x920   : > { %v3761_v26 = vpop.f32.mrf.mxu0 }
 0x921   : > { %v2069_v42 = vsel %vm355_vm0, %v3761_v26, -inf }
 0x928   : > { %v3763_v22 = vpop.f32.mrf.mxu0 }
 0x929   : > { %v2072_v34 = vsel %vm355_vm0, %v3763_v22, -inf }
 0x930   : > { %v3765_v0 = vpop.f32.mrf.mxu0 }
 0x937   : > { %1858 = vmax.xlane.f32.xlu1 %v1857_v32 }
 0x938   : > { %v2066_v48 = vpop.f32.mrf.mxu0 }
 0x939   : > { %v2078_v30 = vsel %vm355_vm0, %v2066_v48, -inf }
 0x93f   : > { %2079 = vmax.xlane.f32.xlu1 %v2078_v30 }
 0x958   : > { %2173 = vrot.lane.b32.xlu1 %v3272_v40, %s3064_s3 }
 0x95f   : > { %v1853_v33 = vpop.xlane.xlu0 %1852 }
 0x960   : > { %v1863_v35 = vsub.f32 %v1841_v53, %v1853_v33 }
 0x962   : > { %v1867_v47 = vmul.f32 1.442695, %v1863_v35 }
 0x964   : > { %2759 = vpow2.f32 %v1867_v47 }
 0x967   : > { %v1856_v37 = vpop.xlane.xlu1 %1855 }
 0x968   : > { %v1864_v2 = vsub.f32 %v1843_v4, %v1856_v37 }
 0x96a   : > { %v3771_v23 = vpop.eup %2759  ;;  %v1869_v61 = vmul.f32 1.442695, %v1864_v2 }
 0x96b   : > { %v1875_v38 = vsel %vm355_vm0, %v3771_v23, 0.0 }
 0x96c   : > { %2761 = vpow2.f32 %v1869_v61  ;;  %1876 = vadd.xlane.f32.xlu2 %v1875_v38 }
 0x972   : > { %v3775_v39 = vpop.eup %2761 }
 0x973   : > { %v1878_v40 = vsel %vm355_vm0, %v3775_v39, 0.0 }
 0x974   : > { %2070 = vmax.xlane.f32.xlu2 %v2069_v42  ;;  %1879 = vadd.xlane.f32.xlu0 %v1878_v40 }
 0x977   : > { %v1862_v41 = vpop.xlane.xlu2 %1861 }
 0x978   : > { %v1866_v36 = vsub.f32 %v1848_v18, %v1862_v41 }
 0x97a   : > { %v1873_v56 = vmul.f32 1.442695, %v1866_v36 }
 0x97c   : > { %2073 = vmax.xlane.f32.xlu0 %v2072_v34 }
 0x97f   : > { %v1956_v46 = vpop.permute.xlu1 %1955 }
 0x980   : > { %1971 = vmatpush.bf16.msrb.mxu3 %v1956_v46 }
 0x984   : > { %1972 = vmatpush.bf16.msrb.mxu3 %v1954_v13 }
 0x98c   : > { %1949 = vrot.lane.b32.xlu2 %v3284_v58, %s3063_s12 }
 0x990   : > { %1951 = vrot.lane.b32.xlu0 %v3280_v52, %s3063_s12  ;;  %s2927_s12 = scalar_lea.hbm %s2926_s30, 16 }
 0x991   : > { %p2928_p1 = scmp.ne.s32.totalorder %s2926_s30, %s2927_s12  ;;  %p2933_p2 = scmp.lt.s32.totalorder %s2931_s5, %s2927_s12 }
 0x993   : > { %p2929_p4 = pnand %p2928_p1, %p3166_p6  ;;  %p2934_p3 = por %p2933_p2, %p2932_p0 }
 0x994   : > { %2171 = vrot.lane.b32.xlu2 %v3276_v45, %s3064_s3  ;;  %v2075_v45 = vsel %vm355_vm0, %v3765_v0, -inf }
 0x995   : > { %p2930_p11 = pneg %p2929_p4 }
 0x997   : > { %p2935_p5 = pnand %p2934_p3, %p2930_p11 }
 0x9aa   : > { %v1859_v59 = vpop.xlane.xlu1 %1858 }
 0x9ab   : > { %v1865_v5 = vsub.f32 %v1846_v17, %v1859_v59 }
 0x9ad   : > { %v1871_v24 = vmul.f32 1.442695, %v1865_v5 }
 0x9af   : > { %2763 = vpow2.f32 %v1871_v24 }
 0x9b2   : > { %v2080_v15 = vpop.xlane.xlu1 %2079 }
 0x9b3   : > { %v2084_v9 = vsub.f32 %v2066_v48, %v2080_v15 }
 0x9b5   : > { %v3789_v60 = vpop.eup %2763  ;;  %v2091_v25 = vmul.f32 1.442695, %v2084_v9 }
 0x9b6   : > { %v1881_v43 = vsel %vm355_vm0, %v3789_v60, 0.0 }
 0x9b7   : > { %2765 = vpow2.f32 %v2091_v25  ;;  %1882 = vadd.xlane.f32.xlu1 %v1881_v43 }
 0x9b8   : > { %2767 = vpow2.f32 %v1873_v56 }
 0x9ba   : > { %2076 = vmax.xlane.f32.xlu0 %v2075_v45 }
 0x9bd   : > { %v3795_v50 = vpop.eup %2765 }
 0x9be   : > { %v3797_v49 = vpop.eup %2767  ;;  %v2102_v63 = vsel %vm355_vm0, %v3795_v50, 0.0 }
 0x9bf   : > { %2103 = vadd.xlane.f32.xlu1 %v2102_v63  ;;  %v1884_v3 = vsel %vm355_vm0, %v3797_v49, 0.0 }
 0x9c2   : > { %1885 = vadd.xlane.f32.xlu0 %v1884_v3 }
 0x9ca   : > { %v2174_v29 = vpop.permute.xlu1 %2173 }
 0x9cb   : > { %2189 = vmatpush.bf16.msra.mxu1 %v2174_v29 }
 0x9df   : > { %v1877_v54 = vpop.xlane.xlu2 %1876 }
 0x9e0   : > { %2769 = vrcp.f32 %v1877_v54  ;;  %v1898_v33 = vand.u32 2147483648, %v1877_v54  ;;  %vm1892_vm12 = vweird.f32 %v1877_v54  ;;  %v1896_v35 = vand.u32 2147483647, %v1877_v54 }
 0x9e2   : > { %v1899_v61 = vor.u32 1.1754944e-38, %v1898_v33  ;;  %vm1897_vm15 = vcmp.eq.f32.partialorder %v1896_v35, 8.507059e+37 }
 0x9e6   : > { %v2770_v8 = vpop.eup %2769 }
 0x9e7   : > { %v2071_v7 = vpop.xlane.xlu2 %2070  ;;  %v1880_v44 = vpop.xlane.xlu0 %1879  ;;  %v1888_v55 = vmul.f32 %v2770_v8, %v1877_v54  ;;  %vm1893_vm9 = vweird.f32 %v2770_v8 }
 0x9e8   : > { %v2081_v51 = vsub.f32 %v3761_v26, %v2071_v7  ;;  %2771 = vrcp.f32 %v1880_v44  ;;  %v1912_v32 = vand.u32 2147483648, %v1880_v44  ;;  %vm1906_vm10 = vweird.f32 %v1880_v44  ;;  %vm1894_vm13 = vmor %vm1892_vm12, %vm1893_vm9 }
 0x9e9   : > { %v1889_v17 = vsub.f32 1.0, %v1888_v55  ;;  %v1910_v30 = vand.u32 2147483647, %v1880_v44 }
 0x9ea   : > { %v2085_v6 = vmul.f32 1.442695, %v2081_v51  ;;  %v1913_v37 = vor.u32 1.1754944e-38, %v1912_v32 }
 0x9eb   : > { %v1890_v31 = vmul.f32 %v2770_v8, %v1889_v17  ;;  %vm1911_vm14 = vcmp.eq.f32.partialorder %v1910_v30, 8.507059e+37 }
 0x9ec   : > { %2773 = vpow2.f32 %v2085_v6 }
 0x9ed   : > { %v1891_v48 = vadd.f32 %v2770_v8, %v1890_v31  ;;  %v480_v31 = vld [vmem:[#allocation8 + $0x18] sm:$0xf] }
 0x9ee   : > { %v2772_v10 = vpop.eup %2771  ;;  %v1995_v32 = vsel %vm879_vm2, %v480_v31, 0 }
 0x9ef   : > { %v1902_v11 = vmul.f32 %v2772_v10, %v1880_v44  ;;  %v1950_v62 = vpop.permute.xlu2 %1949  ;;  %v2074_v1 = vpop.xlane.xlu0 %2073  ;;  %vm1907_vm8 = vweird.f32 %v2772_v10  ;;  %v1895_v2 = vsel %vm1894_vm13, %v2770_v8, %v1891_v48  ;;  %2004 = vmatpush.bf16.msrb.mxu2 %v1995_v32 }
 0x9f0   : > { %v2082_v14 = vsub.f32 %v3763_v22, %v2074_v1  ;;  %vm1908_vm11 = vmor %vm1906_vm10, %vm1907_vm8  ;;  %v1900_v40 = vsel %vm1897_vm15, %v1899_v61, %v1895_v2 }
 0x9f1   : > { %v1903_v16 = vsub.f32 1.0, %v1902_v11  ;;  %v1943_v46 = vmul.f32 %v3771_v23, %v1900_v40 }
 0x9f2   : > { %v3805_v53 = vpop.eup %2773  ;;  %v2087_v4 = vmul.f32 1.442695, %v2082_v14 }
 0x9f3   : > { %v2093_v57 = vsel %vm355_vm0, %v3805_v53, 0.0  ;;  %v1904_v18 = vmul.f32 %v2772_v10, %v1903_v16 }
 0x9f4   : > { %2775 = vpow2.f32 %v2087_v4  ;;  %2094 = vadd.xlane.f32.xlu2 %v2093_v57 }
 0x9f5   : > { %v1905_v26 = vadd.f32 %v2772_v10, %v1904_v18 }
 0x9f7   : > { %v2172_v27 = vpop.permute.xlu2 %2171  ;;  %v1909_v47 = vsel %vm1908_vm11, %v2772_v10, %v1905_v26 }
 0x9f8   : > { %2190 = vmatpush.bf16.msra.mxu1 %v2172_v27  ;;  %v1914_v38 = vsel %vm1911_vm14, %v1913_v37, %v1909_v47 }
 0x9f9   : > { %v1944_v34 = vmul.f32 %v3775_v39, %v1914_v38 }
 0x9fa   : > { %v3809_v21 = vpop.eup %2775 }
 0x9fb   : > { %v2096_v22 = vsel %vm355_vm0, %v3809_v21, 0.0  ;;  %v1947_v13 = vpack.c.bf16 %v1944_v34, %v1943_v46 }
 0x9fc   : > { %2097 = vadd.xlane.f32.xlu0 %v2096_v22 }
 0xa02   : > { %v1952_v42 = vpop.permute.xlu0 %1951 }
 0xa03   : > { %1973 = vmatpush.bf16.msrb.mxu3 %v1952_v42 }
 0xa07   : > { %1974 = vmatpush.bf16.msrb.mxu3 %v1950_v62 }
 0xa0a   : > { %2484 = vmatmul.msk.bf16.vlgmr.msrb.gmra.mxu3 %vm355_vm0, %v1947_v13 }
 0xa0c   : > { %2169 = vrot.lane.b32.xlu2 %v3280_v52, %s3064_s3 }
 0xa10   : > { %2167 = vrot.lane.b32.xlu0 %v3284_v58, %s3064_s3 }
 0xa2a   : > { %v1883_v59 = vpop.xlane.xlu1 %1882 }
 0xa2b   : > { %2777 = vrcp.f32 %v1883_v59  ;;  %v1926_v45 = vand.u32 2147483648, %v1883_v59  ;;  %vm1920_vm4 = vweird.f32 %v1883_v59 }
 0xa2d   : > { %v2077_v5 = vpop.xlane.xlu0 %2076  ;;  %v1927_v44 = vor.u32 1.1754944e-38, %v1926_v45 }
 0xa2e   : > { %v2083_v41 = vsub.f32 %v3765_v0, %v2077_v5  ;;  %v1924_v0 = vand.u32 2147483647, %v1883_v59 }
 0xa30   : > { %v2089_v24 = vmul.f32 1.442695, %v2083_v41  ;;  %vm1925_vm7 = vcmp.eq.f32.partialorder %v1924_v0, 8.507059e+37 }
 0xa31   : > { %v2778_v36 = vpop.eup %2777 }
 0xa32   : > { %v1916_v39 = vmul.f32 %v2778_v36, %v1883_v59  ;;  %2779 = vpow2.f32 %v2089_v24  ;;  %vm1921_vm3 = vweird.f32 %v2778_v36 }
 0xa33   : > { %vm1922_vm5 = vmor %vm1920_vm4, %vm1921_vm3 }
 0xa34   : > { %v1917_v23 = vsub.f32 1.0, %v1916_v39  ;;  %v2104_v39 = vpop.xlane.xlu1 %2103 }
 0xa35   : > { %v1886_v15 = vpop.xlane.xlu0 %1885  ;;  %v2156_v45 = vand.u32 2147483647, %v2104_v39 }
 0xa36   : > { %2781 = vrcp.f32 %v1886_v15  ;;  %v1918_v56 = vmul.f32 %v2778_v36, %v1917_v23  ;;  %v1940_v3 = vand.u32 2147483648, %v1886_v15  ;;  %v1938_v54 = vand.u32 2147483647, %v1886_v15 }
 0xa37   : > { %vm1934_vm8 = vweird.f32 %v1886_v15 }
 0xa38   : > { %v3821_v9 = vpop.eup %2779  ;;  %v1919_v25 = vadd.f32 %v2778_v36, %v1918_v56  ;;  %v1941_v6 = vor.u32 1.1754944e-38, %v1940_v3  ;;  %vm1939_vm10 = vcmp.eq.f32.partialorder %v1938_v54, 8.507059e+37 }
 0xa39   : > { %v2099_v52 = vsel %vm355_vm0, %v3821_v9, 0.0 }
 0xa3a   : > { %2100 = vadd.xlane.f32.xlu2 %v2099_v52  ;;  %v1923_v7 = vsel %vm1922_vm5, %v2778_v36, %v1919_v25 }
 0xa3b   : > { %v1928_v8 = vsel %vm1925_vm7, %v1927_v44, %v1923_v7  ;;  %vm2152_vm7 = vweird.f32 %v2104_v39 }
 0xa3c   : > { %v2782_v58 = vpop.eup %2781  ;;  %v1945_v62 = vmul.f32 %v3789_v60, %v1928_v8 }
 0xa3d   : > { %v1930_v43 = vmul.f32 %v2782_v58, %v1886_v15  ;;  %vm1935_vm6 = vweird.f32 %v2782_v58 }
 0xa3e   : > { %vm1936_vm9 = vmor %vm1934_vm8, %vm1935_vm6 }
 0xa3f   : > { %v1931_v63 = vsub.f32 1.0, %v1930_v43  ;;  %v2158_v43 = vand.u32 2147483648, %v2104_v39 }
 0xa41   : > { %v1932_v29 = vmul.f32 %v2782_v58, %v1931_v63  ;;  %v2159_v7 = vor.u32 1.1754944e-38, %v2158_v43 }
 0xa43   : > { %v1933_v51 = vadd.f32 %v2782_v58, %v1932_v29 }
 0xa45   : > { %v1937_v10 = vsel %vm1936_vm9, %v2782_v58, %v1933_v51 }
 0xa46   : > { %v1942_v11 = vsel %vm1939_vm10, %v1941_v6, %v1937_v10  ;;  %vm2157_vm10 = vcmp.eq.f32.partialorder %v2156_v45, 8.507059e+37 }
 0xa47   : > { %v1946_v1 = vmul.f32 %v3797_v49, %v1942_v11 }
 0xa49   : > { %v1948_v55 = vpack.c.bf16 %v1946_v1, %v1945_v62 }
 0xa4b   : > { %2485 = vmatmul.msk.bf16.gmra.mxu3 %vm355_vm0, %v1948_v55 }
 0xa67   : > { %v2095_v14 = vpop.xlane.xlu2 %2094 }
 0xa68   : > { %2783 = vrcp.f32 %v2095_v14  ;;  %v2116_v22 = vand.u32 2147483648, %v2095_v14  ;;  %vm2110_vm12 = vweird.f32 %v2095_v14  ;;  %v2114_v48 = vand.u32 2147483647, %v2095_v14 }
 0xa6a   : > { %v2117_v2 = vor.u32 1.1754944e-38, %v2116_v22  ;;  %vm2115_vm15 = vcmp.eq.f32.partialorder %v2114_v48, 8.507059e+37 }
 0xa6e   : > { %v2784_v16 = vpop.eup %2783 }
 0xa6f   : > { %v2106_v4 = vmul.f32 %v2784_v16, %v2095_v14  ;;  %v2170_v57 = vpop.permute.xlu2 %2169  ;;  %v2098_v17 = vpop.xlane.xlu0 %2097  ;;  %vm2111_vm11 = vweird.f32 %v2784_v16 }
 0xa70   : > { %2785 = vrcp.f32 %v2098_v17  ;;  %2191 = vmatpush.bf16.msra.mxu1 %v2170_v57  ;;  %vm2112_vm13 = vmor %vm2110_vm12, %vm2111_vm11  ;;  %v2130_v33 = vand.u32 2147483648, %v2098_v17  ;;  %v2128_v37 = vand.u32 2147483647, %v2098_v17  ;;  %vm2124_vm3 = vweird.f32 %v2098_v17 }
 0xa71   : > { %v2107_v18 = vsub.f32 1.0, %v2106_v4  ;;  %2787 = vrcp.f32 %v2104_v39  ;;  %v481_v4 = vld [vmem:[#allocation8 + $0x1c] sm:$0xf] }
 0xa72   : > { %v2131_v42 = vor.u32 1.1754944e-38, %v2130_v33  ;;  %vm2129_vm5 = vcmp.eq.f32.partialorder %v2128_v37, 8.507059e+37  ;;  %v2213_v57 = vsel %vm879_vm2, %v481_v4, 0 }
 0xa73   : > { %v2108_v27 = vmul.f32 %v2784_v16, %v2107_v18  ;;  %2222 = vmatpush.bf16.msra.mxu3 %v2213_v57 }
 0xa75   : > { %v2109_v60 = vadd.f32 %v2784_v16, %v2108_v27 }
 0xa76   : > { %v2786_v26 = vpop.eup %2785 }
 0xa77   : > { %v2120_v49 = vmul.f32 %v2786_v26, %v2098_v17  ;;  %v2113_v35 = vsel %vm2112_vm13, %v2784_v16, %v2109_v60  ;;  %vm2125_vm14 = vweird.f32 %v2786_v26  ;;  %v2788_v23 = vpop.eup %2787  ;;  %v2662_v60 = vld [vmem:[%s3914_s4] ss:$0 sm:$0xff] }
 0xa78   : > { %v2118_v38 = vsel %vm2115_vm15, %v2117_v2, %v2113_v35  ;;  %vm2126_vm4 = vmor %vm2124_vm3, %vm2125_vm14  ;;  %v2148_v15 = vmul.f32 %v2788_v23, %v2104_v39  ;;  %vm2153_vm6 = vweird.f32 %v2788_v23 }
 0xa79   : > { %v2121_v30 = vsub.f32 1.0, %v2120_v49  ;;  %v2161_v46 = vmul.f32 %v3805_v53, %v2118_v38  ;;  %vm2154_vm8 = vmor %vm2152_vm7, %vm2153_vm6 }
 0xa7a   : > { %v2149_v56 = vsub.f32 1.0, %v2148_v15 }
 0xa7b   : > { %v2122_v47 = vmul.f32 %v2786_v26, %v2121_v30 }
 0xa7c   : > { %v2150_v53 = vmul.f32 %v2788_v23, %v2149_v56 }
 0xa7d   : > { %v2123_v61 = vadd.f32 %v2786_v26, %v2122_v47 }
 0xa7f   : > { %v2127_v40 = vsel %vm2126_vm4, %v2786_v26, %v2123_v61 }
 0xa80   : > { %v2132_v34 = vsel %vm2129_vm5, %v2131_v42, %v2127_v40 }
 0xa81   : > { %v2162_v13 = vmul.f32 %v3809_v21, %v2132_v34  ;;  %v2151_v21 = vadd.f32 %v2788_v23, %v2150_v53 }
 0xa82   : > { %v2168_v59 = vpop.permute.xlu0 %2167 }
 0xa83   : > { %v2165_v5 = vpack.c.bf16 %v2162_v13, %v2161_v46  ;;  %2192 = vmatpush.bf16.msra.mxu1 %v2168_v59  ;;  %v2155_v3 = vsel %vm2154_vm8, %v2788_v23, %v2151_v21 }
 0xa84   : > { %v2160_v51 = vsel %vm2157_vm10, %v2159_v7, %v2155_v3 }
 0xa85   : > { %v2164_v62 = vmul.f32 %v3795_v50, %v2160_v51 }
 0xa86   : > { %2490 = vmatmul.msk.bf16.vlgmr.msra.gmra.mxu1 %vm355_vm0, %v2165_v5 }
 0xa8d   : > { %v1976_v41 = vpop.f32.mrf.mxu3 }
 0xa95   : > { %v1978_v24 = vpop.f32.mrf.mxu3 }
 0xa96   : > { %v1986_v36 = vpack.c.bf16 %v1978_v24, %v1976_v41 }
 0xa98   : > { %2486 = vmatmul.msk.bf16.vlgmr.msrb.gmra.mxu2 %vm512_vm1, %v1986_v36 }
 0xaad   : > { %v2101_v52 = vpop.xlane.xlu2 %2100 }
 0xaae   : > { %2789 = vrcp.f32 %v2101_v52  ;;  %v2144_v63 = vand.u32 2147483648, %v2101_v52  ;;  %v2142_v54 = vand.u32 2147483647, %v2101_v52  ;;  %vm2138_vm11 = vweird.f32 %v2101_v52 }
 0xab0   : > { %v2145_v6 = vor.u32 1.1754944e-38, %v2144_v63  ;;  %vm2143_vm13 = vcmp.eq.f32.partialorder %v2142_v54, 8.507059e+37 }
 0xab4   : > { %v2790_v58 = vpop.eup %2789 }
 0xab5   : > { %v2134_v25 = vmul.f32 %v2790_v58, %v2101_v52  ;;  %vm2139_vm9 = vweird.f32 %v2790_v58 }
 0xab6   : > { %vm2140_vm12 = vmor %vm2138_vm11, %vm2139_vm9 }
 0xab7   : > { %v2135_v0 = vsub.f32 1.0, %v2134_v25 }
 0xab9   : > { %v2136_v29 = vmul.f32 %v2790_v58, %v2135_v0 }
 0xabb   : > { %v2137_v44 = vadd.f32 %v2790_v58, %v2136_v29 }
 0xabd   : > { %v2141_v8 = vsel %vm2140_vm12, %v2790_v58, %v2137_v44 }
 0xabe   : > { %v2146_v10 = vsel %vm2143_vm13, %v2145_v6, %v2141_v8 }
 0xabf   : > { %v2163_v11 = vmul.f32 %v3821_v9, %v2146_v10 }
 0xac1   : > { %v2166_v1 = vpack.c.bf16 %v2164_v62, %v2163_v11 }
 0xac3   : > { %2491 = vmatmul.msk.bf16.gmra.mxu1 %vm355_vm0, %v2166_v1  ;;  %vm2250_vm0 = vcmask 519168  }
 0xace   : > { %v1981_v55 = vpop.f32.mrf.mxu3 }
 0xad6   : > { %v1983_v14 = vpop.f32.mrf.mxu3 }
 0xad7   : > { %v1987_v16 = vpack.c.bf16 %v1983_v14, %v1981_v55 }
 0xad9   : > { %2487 = vmatmul.msk.bf16.gmra.mxu2 %vm512_vm1, %v1987_v16 }
 0xb03   : > { %v2194_v17 = vpop.f32.mrf.mxu1 }
 0xb0b   : > { %v2196_v18 = vpop.f32.mrf.mxu1 }
 0xb0c   : > { %v2204_v27 = vpack.c.bf16 %v2196_v18, %v2194_v17 }
 0xb0e   : > { %2492 = vmatmul.msk.bf16.vlgmr.msra.gmra.mxu3 %vm512_vm1, %v2204_v27 }
 0xb1b   : > { %v2006_v26 = vpop.f32.mrf.mxu2 }
 0xb1c   : > { %v2016_v32 = vadd.f32 %v2006_v26, %v3745_v28 }
 0xb23   : > { %v2008_v30 = vpop.f32.mrf.mxu2 }
 0xb24   : > { %v2017_v35 = vadd.f32 %v2008_v30, %v3748_v12 }
 0xb40   : > { %v2199_v50 = vpop.f32.mrf.mxu1 }
 0xb48   : > { %v2201_v9 = vpop.f32.mrf.mxu1 }
 0xb49   : > { %v2205_v31 = vpack.c.bf16 %v2201_v9, %v2199_v50 }
 0xb4b   : > { %2493 = vmatmul.msk.bf16.gmra.mxu3 %vm512_vm1, %v2205_v31 }
 0xb5c   : > { %v2011_v61 = vpop.f32.mrf.mxu2 }
 0xb5d   : > { %v2018_v38 = vadd.f32 %v2011_v61, %v3757_v19 }
 0xb64   : > { %v2013_v12 = vpop.f32.mrf.mxu2 }
 0xb65   : > { %v2019_v13 = vadd.f32 %v2013_v12, %v3759_v20 }
 0xb91   : > { %v2224_v49 = vpop.f32.mrf.mxu3 }
 0xb92   : > { %v2234_v22 = vadd.f32 %v2224_v49, %v2016_v32 }
 0xb94   : > { %v2242_v48 = vadd.f32 %v2662_v60, %v2234_v22 }
 0xb96   : > { %v2246_v33 = vpack.c.bf16 %v2242_v48, %v2242_v48 }
 0xb98   : > { %2251 = vst.msk [vmem:[%s308_s6] sm:$0xf] %vm2250_vm0, %v2246_v33 }
 0xb99   : > { %v2226_v28 = vpop.f32.mrf.mxu3 }
 0xb9a   : > { %v2235_v47 = vadd.f32 %v2226_v28, %v2017_v35 }
 0xb9c   : > { %v2243_v37 = vadd.f32 %v2662_v60, %v2235_v47 }
 0xb9e   : > { %v2247_v2 = vpack.c.bf16 %v2243_v37, %v2243_v37 }
 0xba0   : > { %2252 = vst.msk [vmem:[%s308_s6 + $0x4] sm:$0xf] %vm2250_vm0, %v2247_v2 }
 0xbce   : > { %v2229_v42 = vpop.f32.mrf.mxu3 }
 0xbcf   : > { %v2236_v40 = vadd.f32 %v2229_v42, %v2018_v38 }
 0xbd1   : > { %v2244_v34 = vadd.f32 %v2662_v60, %v2236_v40 }
 0xbd3   : > { %v2248_v46 = vpack.c.bf16 %v2244_v34, %v2244_v34 }
 0xbd5   : > { %2253 = vst.msk [vmem:[%s308_s6 + $0x8] sm:$0xf] %vm2250_vm0, %v2248_v46 }
 0xbd6   : > { %v2231_v59 = vpop.f32.mrf.mxu3 }
 0xbd7   : > { %v2237_v19 = vadd.f32 %v2231_v59, %v2019_v13 }
 0xbd9   : > { %v2245_v5 = vadd.f32 %v2662_v60, %v2237_v19 }
 0xbdb   : > { %v2249_v41 = vpack.c.bf16 %v2245_v5, %v2245_v5 }
 0xbdd   : > { %2254 = vst.msk [vmem:[%s308_s6 + $0xc] sm:$0xf] %vm2250_vm0, %v2249_v41 }
 0xbde   : > { %2938 = shalt.err (!%p2935_p5)
}
 0xbdf   : > { %s3065_s13 = smov 4  }
 0xbe0   : > { %2523 = dma.vmem_to_hbm [thread:$0]  (%p3166_p6), %s2271_s25, 256, %s2273_s14, %s2256_s16, %s3050_s26, %s3050_s26, %s3065_s13  }
 0xbe1 PF: > { %s3950_s6 = sld [smem:[#allocation15_spill]]  ;;  %p2550_p7 = scmp.ge.s32.totalorder %s3041_s28, 2 }
 0xbe3   : > { %p2540_p8 = pnand %p2550_p7, %p3172_p10 }
 0xbe5   : > { %p2541_p9 = pneg %p2540_p8 }
 0xbe7   : > { %s2287_s10 = sand.u32 1, %s3950_s6  }
 0xbe8   : > { %s2288_s15 = scalar_lea.sflag [#allocation4], %s2287_s10 }
 0xbe9   : > { %2996 = dma.done.wait (%p2541_p9), %s2288_s15, 256  }
 0xbea   : > { %2998 = vsyncadd (%p2541_p9), %s2288_s15, 4294967040  ;;  %s23_s28 = sadd.s32 1, %s3041_s28   ;;  %s3952_s24 = sld [smem:[#allocation16_spill]] }
 0xbeb   : > { %p20_p12 = scmp.ge.s32.totalorder %s23_s28, 6   ;;  %s3953_s26 = sld [smem:[#allocation19_spill]] }
 0xbec   : > { %s3954_s2 = sld [smem:[#allocation20_spill]]  ;;  %s3955_s18 = smov %s3005_s19 }
 0xbed   : > { %s3956_s19 = smov %s3009_s20  ;;  %s3957_s20 = smov %s3230_s21 }
 0xbee   : > { %s3958_s21 = smov %s3017_s22  ;;  %s3959_s22 = smov %s3021_s23 }
 0xbef   : > { %s3960_s23 = smov %s3227_s17  ;;  %s3961_s25 = smov %s3037_s27 }
 0xbf0   :  { %22 = sbr.rel (!%p20_p12) target bundleno = 16 (0x10), region = 98 }
 0xbf2   : > { %s3962_s27 = smov %s3954_s2 }
 0xbf5   :  { %2294 = vsyncpa [#allocation3], 1 }
 0xbf6   :  { %2296 = vsyncpa [#allocation3 + $0x1], 1 }
 0xbf7   :  { %2297 = vsyncpa [#allocation6], 1 }
 0xbf8   :  { %2298 = vsyncpa [#allocation9], 1 }
 0xbf9   :  { %2299 = vsyncpa [#allocation4], 1 }
 0xbfa   :  { %2301 = vsyncpa [#allocation4 + $0x1], 1 }

</bundles_post_ra>
